<compile_context>
chip_gen: v7x
topology: tpu7x:2x2x1
jax: 0.10.0
libtpu: 0.0.40
codegen_flags: <defaults>
</compile_context>

<pallas_src>
import functools
import math

import jax
import jax.numpy as jnp
import numpy as np
from jax.experimental import pallas as pl
from jax.experimental.pallas import tpu as pltpu


# -----------------------------------------------------------------------------
# Helpers from the scale_cnn package (source not provided with the module;
# deterministic re-implementations with matching shapes/semantics).
# -----------------------------------------------------------------------------
def bilinear_matrix(n, m, scale):
    """Bilinear resampling matrix, shape [n, n, m, m]."""
    s = np.arange(n) - (n - 1) / 2.0
    t = (np.arange(m) - (m - 1) / 2.0) / scale
    d = np.abs(s[:, None] - t[None, :])
    w1 = np.clip(1.0 - d, 0.0, None)                 # [n, m]
    return np.einsum('ay,bx->abyx', w1, w1)          # [n, n, m, m]


def low_pass_filter(weight, scale):
    # Filters are *up*-sampled for scale >= 1, so no anti-alias blur is needed.
    # TODO(synk): gaussian-blur branch for scale < 1 (ratio < 1 configs) omitted.
    assert scale >= 1.0
    return weight


# -----------------------------------------------------------------------------
# Fused Pallas kernel: one grid step = one (batch, scale) image.
# -----------------------------------------------------------------------------
def _scale_conv_kernel(x_ref, w_ref, b_ref, o_ref, *, K, Wp, Lw):
    # x_ref: (1, 1, Cin_tot, Lp)     bf16 zero-padded, row-flattened image
    #                                (Lp = Hp*Wp + K-1 so all tap slices are in-bounds)
    # w_ref: (1, K*K, Cout, Cin_tot) bf16 tap-major weights for this scale
    # b_ref: (Cout, 1)               f32 bias
    # o_ref: (1, 1, Cout, Lw)        f32, Lw = Ho*Wp "wide" rows (cropped in wrapper)
    Cout = o_ref.shape[2]
    # Bias-initialised f32 accumulator (no separate bias pass after the loop).
    acc = jnp.broadcast_to(b_ref[...], (Cout, Lw))
    # Static unroll over taps: each tap is one lane-dense MXU matmul.
    for dy in range(K):
        for dx in range(K):
            off = dy * Wp + dx                               # static lane offset
            patch = x_ref[0, 0, :, off:off + Lw]             # (Cin_tot, Lw) bf16
            acc = acc + jnp.dot(w_ref[0, dy * K + dx],       # (Cout, Cin_tot) bf16
                                patch,
                                preferred_element_type=jnp.float32)
    o_ref[0, 0] = acc


def scale_conv_pallas(x_flat, w_all, bias, *, K, Wp, Lw):
    """Fused multi-scale conv. x_flat: (B,S,Cin_tot,Lp) bf16, w_all: (S,K*K,Cout,Cin_tot)
    bf16, bias: (Cout,1) f32  ->  (B,S,Cout,Lw) f32 "wide" output rows."""
    B, S, Cin_tot, Lp = x_flat.shape
    _, KK, Cout, _ = w_all.shape
    assert KK == K * K
    return pl.pallas_call(
        functools.partial(_scale_conv_kernel, K=K, Wp=Wp, Lw=Lw),
        out_shape=jax.ShapeDtypeStruct((B, S, Cout, Lw), jnp.float32),
        grid=(B, S),
        in_specs=[
            pl.BlockSpec((1, 1, Cin_tot, Lp), lambda b, s: (b, s, 0, 0)),
            pl.BlockSpec((1, KK, Cout, Cin_tot), lambda b, s: (s, 0, 0, 0)),
            pl.BlockSpec((Cout, 1), lambda b, s: (0, 0)),
        ],
        out_specs=pl.BlockSpec((1, 1, Cout, Lw), lambda b, s: (b, s, 0, 0)),
        compiler_params=pltpu.CompilerParams(
            dimension_semantics=("parallel", "parallel")),
    )(x_flat, w_all, bias)


# -----------------------------------------------------------------------------
# ScaleConvolution module (JAX/Pallas port)
# -----------------------------------------------------------------------------
class ScaleConvolutionPallas:
    def __init__(self, features_in, features_out, size, ratio, nratio,
                 srange=0, boundary_condition='dirichlet', padding=0,
                 bias=True, *, key):
        sizes, mats = [], []
        for i in range(nratio):
            scale = ratio ** i
            fs = math.ceil(size * scale)
            if fs % 2 != size % 2:
                fs += 1
            sizes.append(fs)
            m = bilinear_matrix(size, fs, scale) * ratio ** (-2 * i)
            mats.append(jnp.asarray(m.reshape(size ** 2, fs ** 2), jnp.float32))
        self.sizes = sizes
        self.bilinear_matricies = mats
        self.size, self.ratio, self.nratio, self.srange = size, ratio, nratio, srange
        self.nf_in, self.nf_out = features_in, features_out
        self.boundary_condition = boundary_condition
        self.padding = padding

        # reset_parameters(): clipped normal init (deterministic via PRNGKey)
        std = 1 / math.sqrt((1 + 2 * srange) * features_in * size ** 2)
        std *= math.sqrt(nratio)
        w = std * jax.random.normal(
            key, (features_out, 1 + 2 * srange, features_in, size * size),
            dtype=jnp.float32)
        self.weight = jnp.clip(w, -2 * std, 2 * std)
        self.bias = jnp.zeros((features_out,), jnp.float32) if bias else None

    # --- kernel construction (pure JAX glue) ---------------------------------
    def _kernels_for_scale(self, i):
        """(Cout, 1+2s, Cin, K_i, K_i) f32 resampled filters for scale i."""
        weight = low_pass_filter(self.weight, self.ratio ** i)
        k = jnp.einsum('odis,sz->odiz', weight, self.bilinear_matricies[i])
        return k.reshape(self.nf_out, 1 + 2 * self.srange, self.nf_in,
                         self.sizes[i], self.sizes[i])

    def _fused_weights(self):
        """(S, Kmax*Kmax, Cout, Cin_tot) bf16, spatially zero-padded to Kmax."""
        Kmax = max(self.sizes)
        Cin_tot = (1 + 2 * self.srange) * self.nf_in
        ws = []
        for i in range(self.nratio):
            k = self._kernels_for_scale(i).reshape(
                self.nf_out, Cin_tot, self.sizes[i], self.sizes[i])
            p = (Kmax - self.sizes[i]) // 2           # parity matches -> exact
            k = jnp.pad(k, ((0, 0), (0, 0), (p, p), (p, p)))
            k = jnp.transpose(k, (2, 3, 0, 1)).reshape(Kmax * Kmax,
                                                       self.nf_out, Cin_tot)
            ws.append(k)
        return jnp.stack(ws, axis=0).astype(jnp.bfloat16)

    def _fused_inputs(self, x, P, Kmax):
        """x (B,S,Cin,H,W) -> (B,S,Cin_tot,Hp*Wp + Kmax-1) bf16 flat padded slabs."""
        B, S, Cin, H, W = x.shape
        s = self.srange
        slabs = []
        for i in range(S):
            blocks = []
            for j in range(1 + 2 * s):
                src = i + j - s
                if self.boundary_condition == 'dirichlet':
                    blocks.append(x[:, src] if 0 <= src < S
                                  else jnp.zeros_like(x[:, 0]))
                elif self.boundary_condition == 'neumann':
                    blocks.append(x[:, min(max(src, 0), S - 1)])
                else:
                    raise ValueError('boundary_condition must be dirichlet or neumann')
            slabs.append(jnp.concatenate(blocks, axis=1))  # (B, Cin_tot, H, W)
        slab = jnp.stack(slabs, axis=1)                    # (B, S, Cin_tot, H, W)
        slab = jnp.pad(slab, ((0, 0), (0, 0), (0, 0), (P, P), (P, P)))
        Hp, Wp = H + 2 * P, W + 2 * P
        slab = slab.reshape(B, S, slab.shape[2], Hp * Wp)  # free reshape (contiguous)
        slab = jnp.pad(slab, ((0, 0), (0, 0), (0, 0), (0, Kmax - 1)))  # slice tail
        return slab.astype(jnp.bfloat16)

    # --- forward --------------------------------------------------------------
    def __call__(self, x):
        """x: [batch, sigma, f_in, y, x] -> [batch, sigma, f_out, y', x']"""
        B, S, Fin, H, W = x.shape
        assert S == self.nratio and Fin == self.nf_in
        Kmax, Kmin = max(self.sizes), min(self.sizes)
        P = self.padding + (Kmax - Kmin) // 2          # uniform padding for all scales
        Hp, Wp = H + 2 * P, W + 2 * P
        Ho, Wo = Hp - Kmax + 1, Wp - Kmax + 1

        w_all = self._fused_weights()
        x_flat = self._fused_inputs(x, P, Kmax)
        bias = (self.bias if self.bias is not None
                else jnp.zeros((self.nf_out,), jnp.float32)).reshape(self.nf_out, 1)

        out_wide = scale_conv_pallas(x_flat, w_all, bias, K=Kmax, Wp=Wp, Lw=Ho * Wp)
        out = out_wide.reshape(B, S, self.nf_out, Ho, Wp)[:, :, :, :, :Wo]
        return out

    # --- pure-JAX reference mirroring the original torch forward --------------
    def reference(self, x, *, round_bf16=True):
        B, S, Fin, H, W = x.shape
        s = self.srange
        bias = (self.bias if self.bias is not None
                else jnp.zeros((self.nf_out,), jnp.float32))
        cast = ((lambda a: a.astype(jnp.bfloat16).astype(jnp.float32))
                if round_bf16 else (lambda a: a))
        outs = []
        for i in range(S):
            pad = self.padding + (self.sizes[i] - min(self.sizes)) // 2
            kernels = self._kernels_for_scale(i)
            i0 = max(0, i - s)
            num = 1 + min(s, S - i - 1) + min(i, s)
            if self.boundary_condition == 'dirichlet':
                j0 = max(s - i, 0)
                xs = x[:, i0:i0 + num].reshape(B, num * Fin, H, W)
                ks = kernels[:, j0:j0 + num].reshape(
                    self.nf_out, num * Fin, self.sizes[i], self.sizes[i])
            else:  # neumann
                eb, et = max(0, s - i), max(0, s + i - S + 1)
                parts = []
                if eb:
                    parts.append(jnp.tile(x[:, 0], (1, eb, 1, 1)))
                parts.append(x[:, i0:i0 + num].reshape(B, num * Fin, H, W))
                if et:
                    parts.append(jnp.tile(x[:, -1], (1, et, 1, 1)))
                xs = jnp.concatenate(parts, axis=1)
                ks = kernels.reshape(self.nf_out, (1 + 2 * s) * Fin,
                                     self.sizes[i], self.sizes[i])
            o = jax.lax.conv_general_dilated(
                cast(xs), cast(ks), (1, 1), [(pad, pad), (pad, pad)],
                dimension_numbers=('NCHW', 'OIHW', 'NCHW'),
                precision=jax.lax.Precision.HIGHEST)
            o = o + bias[None, :, None, None]
            outs.append(o[:, None])
        return jnp.concatenate(outs, axis=1)


if __name__ == "__main__":
    key = jax.random.PRNGKey(0)
    kw, kx = jax.random.split(key)

    B, nratio, f_in, H, W = 2, 3, 4, 16, 16
    f_out, size, srange = 8, 3, 1
    ratio = 2 ** 0.5

    x = jax.random.normal(kx, (B, nratio, f_in, H, W), dtype=jnp.float32)

    for bc in ("dirichlet", "neumann"):
        mod = ScaleConvolutionPallas(f_in, f_out, size, ratio, nratio,
                                     srange=srange, boundary_condition=bc,
                                     padding=0, bias=True, key=kw)
        out = jax.block_until_ready(jax.jit(mod.__call__)(x))
        assert out.shape == (B, nratio, f_out, H - size + 1, W - size + 1), out.shape

        # Tight check: reference fed the same bf16-rounded operands (the only
        # numerical deviation of the kernel from the f32 module is bf16 inputs).
        ref_bf16 = jax.block_until_ready(mod.reference(x, round_bf16=True))
        np.testing.assert_allclose(np.asarray(out), np.asarray(ref_bf16),
                                   atol=2e-3, rtol=2e-3)
        # Loose check against the pure-f32 module semantics.
        ref_f32 = jax.block_until_ready(mod.reference(x, round_bf16=False))
        np.testing.assert_allclose(np.asarray(out), np.asarray(ref_f32),
                                   atol=5e-2, rtol=5e-2)

    print("KERNEL_OK")
</pallas_src>

<mosaic_0001>
module attributes {stable_mosaic.version = 11 : i64} {
  func.func @_scale_conv_kernel(%arg0: i32, %arg1: i32, %arg2: memref<1x1x12x406xbf16, #tpu.memory_space<vmem>>, %arg3: memref<1x49x8x12xbf16, #tpu.memory_space<vmem>>, %arg4: memref<8x1xf32, #tpu.memory_space<vmem>>, %arg5: memref<1x1x8x280xf32, #tpu.memory_space<vmem>>) attributes {dimension_semantics = [#tpu.dimension_semantics<parallel>, #tpu.dimension_semantics<parallel>], iteration_bounds = array<i64: 2, 3>, scalar_prefetch = 0 : i64, scratch_operands = 0 : i64, tpu.core_type = #tpu.core_type<tc>, window_params = [{transform_indices = @transform_0, window_bounds = array<i64: 1, 1, 12, 406>}, {transform_indices = @transform_1, window_bounds = array<i64: 1, 49, 8, 12>}, {pipeline_mode = #tpu.pipeline_mode<synchronous>, transform_indices = @transform_2, window_bounds = array<i64: 8, 1>}, {transform_indices = @transform_3, window_bounds = array<i64: 1, 1, 8, 280>}]} {
    %c0 = arith.constant 0 : index
    %c0_0 = arith.constant 0 : index
    %0 = vector.load %arg4[%c0, %c0_0] : memref<8x1xf32, #tpu.memory_space<vmem>>, vector<8x1xf32>
    %1 = vector.shape_cast %0 : vector<8x1xf32> to vector<8x1xf32>
    %2 = vector.broadcast %1 : vector<8x1xf32> to vector<8x280xf32>
    %c0_1 = arith.constant 0 : index
    %c0_2 = arith.constant 0 : index
    %c0_3 = arith.constant 0 : index
    %c0_4 = arith.constant 0 : index
    %3 = vector.load %arg2[%c0_1, %c0_2, %c0_3, %c0_4] : memref<1x1x12x406xbf16, #tpu.memory_space<vmem>>, vector<1x1x12x280xbf16>
    %4 = vector.shape_cast %3 : vector<1x1x12x280xbf16> to vector<12x280xbf16>
    %c0_5 = arith.constant 0 : index
    %c0_6 = arith.constant 0 : index
    %c0_7 = arith.constant 0 : index
    %c0_8 = arith.constant 0 : index
    %5 = vector.load %arg3[%c0_5, %c0_6, %c0_7, %c0_8] : memref<1x49x8x12xbf16, #tpu.memory_space<vmem>>, vector<1x1x8x12xbf16>
    %6 = vector.shape_cast %5 : vector<1x1x8x12xbf16> to vector<8x12xbf16>
    %cst = arith.constant dense<0.000000e+00> : vector<8x280xf32>
    %7 = tpu.matmul %6, %4, %cst {dimension_numbers = #tpu.dot_dimension_numbers<[1], [0], [0], [1], [0, 0, 1, 1], [], []>} : vector<8x12xbf16>, vector<12x280xbf16>, vector<8x280xf32> -> vector<8x280xf32>
    %8 = arith.addf %2, %7 : vector<8x280xf32>
    %c0_9 = arith.constant 0 : index
    %c0_10 = arith.constant 0 : index
    %c0_11 = arith.constant 0 : index
    %c1 = arith.constant 1 : index
    %9 = vector.load %arg2[%c0_9, %c0_10, %c0_11, %c1] : memref<1x1x12x406xbf16, #tpu.memory_space<vmem>>, vector<1x1x12x280xbf16>
    %10 = vector.shape_cast %9 : vector<1x1x12x280xbf16> to vector<12x280xbf16>
    %c0_12 = arith.constant 0 : index
    %c1_13 = arith.constant 1 : index
    %c0_14 = arith.constant 0 : index
    %c0_15 = arith.constant 0 : index
    %11 = vector.load %arg3[%c0_12, %c1_13, %c0_14, %c0_15] : memref<1x49x8x12xbf16, #tpu.memory_space<vmem>>, vector<1x1x8x12xbf16>
    %12 = vector.shape_cast %11 : vector<1x1x8x12xbf16> to vector<8x12xbf16>
    %cst_16 = arith.constant dense<0.000000e+00> : vector<8x280xf32>
    %13 = tpu.matmul %12, %10, %cst_16 {dimension_numbers = #tpu.dot_dimension_numbers<[1], [0], [0], [1], [0, 0, 1, 1], [], []>} : vector<8x12xbf16>, vector<12x280xbf16>, vector<8x280xf32> -> vector<8x280xf32>
    %14 = arith.addf %8, %13 : vector<8x280xf32>
    %c0_17 = arith.constant 0 : index
    %c0_18 = arith.constant 0 : index
    %c0_19 = arith.constant 0 : index
    %c2 = arith.constant 2 : index
    %15 = vector.load %arg2[%c0_17, %c0_18, %c0_19, %c2] : memref<1x1x12x406xbf16, #tpu.memory_space<vmem>>, vector<1x1x12x280xbf16>
    %16 = vector.shape_cast %15 : vector<1x1x12x280xbf16> to vector<12x280xbf16>
    %c0_20 = arith.constant 0 : index
    %c2_21 = arith.constant 2 : index
    %c0_22 = arith.constant 0 : index
    %c0_23 = arith.constant 0 : index
    %17 = vector.load %arg3[%c0_20, %c2_21, %c0_22, %c0_23] : memref<1x49x8x12xbf16, #tpu.memory_space<vmem>>, vector<1x1x8x12xbf16>
    %18 = vector.shape_cast %17 : vector<1x1x8x12xbf16> to vector<8x12xbf16>
    %cst_24 = arith.constant dense<0.000000e+00> : vector<8x280xf32>
    %19 = tpu.matmul %18, %16, %cst_24 {dimension_numbers = #tpu.dot_dimension_numbers<[1], [0], [0], [1], [0, 0, 1, 1], [], []>} : vector<8x12xbf16>, vector<12x280xbf16>, vector<8x280xf32> -> vector<8x280xf32>
    %20 = arith.addf %14, %19 : vector<8x280xf32>
    %c0_25 = arith.constant 0 : index
    %c0_26 = arith.constant 0 : index
    %c0_27 = arith.constant 0 : index
    %c3 = arith.constant 3 : index
    %21 = vector.load %arg2[%c0_25, %c0_26, %c0_27, %c3] : memref<1x1x12x406xbf16, #tpu.memory_space<vmem>>, vector<1x1x12x280xbf16>
    %22 = vector.shape_cast %21 : vector<1x1x12x280xbf16> to vector<12x280xbf16>
    %c0_28 = arith.constant 0 : index
    %c3_29 = arith.constant 3 : index
    %c0_30 = arith.constant 0 : index
    %c0_31 = arith.constant 0 : index
    %23 = vector.load %arg3[%c0_28, %c3_29, %c0_30, %c0_31] : memref<1x49x8x12xbf16, #tpu.memory_space<vmem>>, vector<1x1x8x12xbf16>
    %24 = vector.shape_cast %23 : vector<1x1x8x12xbf16> to vector<8x12xbf16>
    %cst_32 = arith.constant dense<0.000000e+00> : vector<8x280xf32>
    %25 = tpu.matmul %24, %22, %cst_32 {dimension_numbers = #tpu.dot_dimension_numbers<[1], [0], [0], [1], [0, 0, 1, 1], [], []>} : vector<8x12xbf16>, vector<12x280xbf16>, vector<8x280xf32> -> vector<8x280xf32>
    %26 = arith.addf %20, %25 : vector<8x280xf32>
    %c0_33 = arith.constant 0 : index
    %c0_34 = arith.constant 0 : index
    %c0_35 = arith.constant 0 : index
    %c4 = arith.constant 4 : index
    %27 = vector.load %arg2[%c0_33, %c0_34, %c0_35, %c4] : memref<1x1x12x406xbf16, #tpu.memory_space<vmem>>, vector<1x1x12x280xbf16>
    %28 = vector.shape_cast %27 : vector<1x1x12x280xbf16> to vector<12x280xbf16>
    %c0_36 = arith.constant 0 : index
    %c4_37 = arith.constant 4 : index
    %c0_38 = arith.constant 0 : index
    %c0_39 = arith.constant 0 : index
    %29 = vector.load %arg3[%c0_36, %c4_37, %c0_38, %c0_39] : memref<1x49x8x12xbf16, #tpu.memory_space<vmem>>, vector<1x1x8x12xbf16>
    %30 = vector.shape_cast %29 : vector<1x1x8x12xbf16> to vector<8x12xbf16>
    %cst_40 = arith.constant dense<0.000000e+00> : vector<8x280xf32>
    %31 = tpu.matmul %30, %28, %cst_40 {dimension_numbers = #tpu.dot_dimension_numbers<[1], [0], [0], [1], [0, 0, 1, 1], [], []>} : vector<8x12xbf16>, vector<12x280xbf16>, vector<8x280xf32> -> vector<8x280xf32>
    %32 = arith.addf %26, %31 : vector<8x280xf32>
    %c0_41 = arith.constant 0 : index
    %c0_42 = arith.constant 0 : index
    %c0_43 = arith.constant 0 : index
    %c5 = arith.constant 5 : index
    %33 = vector.load %arg2[%c0_41, %c0_42, %c0_43, %c5] : memref<1x1x12x406xbf16, #tpu.memory_space<vmem>>, vector<1x1x12x280xbf16>
    %34 = vector.shape_cast %33 : vector<1x1x12x280xbf16> to vector<12x280xbf16>
    %c0_44 = arith.constant 0 : index
    %c5_45 = arith.constant 5 : index
    %c0_46 = arith.constant 0 : index
    %c0_47 = arith.constant 0 : index
    %35 = vector.load %arg3[%c0_44, %c5_45, %c0_46, %c0_47] : memref<1x49x8x12xbf16, #tpu.memory_space<vmem>>, vector<1x1x8x12xbf16>
    %36 = vector.shape_cast %35 : vector<1x1x8x12xbf16> to vector<8x12xbf16>
    %cst_48 = arith.constant dense<0.000000e+00> : vector<8x280xf32>
    %37 = tpu.matmul %36, %34, %cst_48 {dimension_numbers = #tpu.dot_dimension_numbers<[1], [0], [0], [1], [0, 0, 1, 1], [], []>} : vector<8x12xbf16>, vector<12x280xbf16>, vector<8x280xf32> -> vector<8x280xf32>
    %38 = arith.addf %32, %37 : vector<8x280xf32>
    %c0_49 = arith.constant 0 : index
    %c0_50 = arith.constant 0 : index
    %c0_51 = arith.constant 0 : index
    %c6 = arith.constant 6 : index
    %39 = vector.load %arg2[%c0_49, %c0_50, %c0_51, %c6] : memref<1x1x12x406xbf16, #tpu.memory_space<vmem>>, vector<1x1x12x280xbf16>
    %40 = vector.shape_cast %39 : vector<1x1x12x280xbf16> to vector<12x280xbf16>
    %c0_52 = arith.constant 0 : index
    %c6_53 = arith.constant 6 : index
    %c0_54 = arith.constant 0 : index
    %c0_55 = arith.constant 0 : index
    %41 = vector.load %arg3[%c0_52, %c6_53, %c0_54, %c0_55] : memref<1x49x8x12xbf16, #tpu.memory_space<vmem>>, vector<1x1x8x12xbf16>
    %42 = vector.shape_cast %41 : vector<1x1x8x12xbf16> to vector<8x12xbf16>
    %cst_56 = arith.constant dense<0.000000e+00> : vector<8x280xf32>
    %43 = tpu.matmul %42, %40, %cst_56 {dimension_numbers = #tpu.dot_dimension_numbers<[1], [0], [0], [1], [0, 0, 1, 1], [], []>} : vector<8x12xbf16>, vector<12x280xbf16>, vector<8x280xf32> -> vector<8x280xf32>
    %44 = arith.addf %38, %43 : vector<8x280xf32>
    %c0_57 = arith.constant 0 : index
    %c0_58 = arith.constant 0 : index
    %c0_59 = arith.constant 0 : index
    %c20 = arith.constant 20 : index
    %45 = vector.load %arg2[%c0_57, %c0_58, %c0_59, %c20] : memref<1x1x12x406xbf16, #tpu.memory_space<vmem>>, vector<1x1x12x280xbf16>
    %46 = vector.shape_cast %45 : vector<1x1x12x280xbf16> to vector<12x280xbf16>
    %c0_60 = arith.constant 0 : index
    %c7 = arith.constant 7 : index
    %c0_61 = arith.constant 0 : index
    %c0_62 = arith.constant 0 : index
    %47 = vector.load %arg3[%c0_60, %c7, %c0_61, %c0_62] : memref<1x49x8x12xbf16, #tpu.memory_space<vmem>>, vector<1x1x8x12xbf16>
    %48 = vector.shape_cast %47 : vector<1x1x8x12xbf16> to vector<8x12xbf16>
    %cst_63 = arith.constant dense<0.000000e+00> : vector<8x280xf32>
    %49 = tpu.matmul %48, %46, %cst_63 {dimension_numbers = #tpu.dot_dimension_numbers<[1], [0], [0], [1], [0, 0, 1, 1], [], []>} : vector<8x12xbf16>, vector<12x280xbf16>, vector<8x280xf32> -> vector<8x280xf32>
    %50 = arith.addf %44, %49 : vector<8x280xf32>
    %c0_64 = arith.constant 0 : index
    %c0_65 = arith.constant 0 : index
    %c0_66 = arith.constant 0 : index
    %c21 = arith.constant 21 : index
    %51 = vector.load %arg2[%c0_64, %c0_65, %c0_66, %c21] : memref<1x1x12x406xbf16, #tpu.memory_space<vmem>>, vector<1x1x12x280xbf16>
    %52 = vector.shape_cast %51 : vector<1x1x12x280xbf16> to vector<12x280xbf16>
    %c0_67 = arith.constant 0 : index
    %c8 = arith.constant 8 : index
    %c0_68 = arith.constant 0 : index
    %c0_69 = arith.constant 0 : index
    %53 = vector.load %arg3[%c0_67, %c8, %c0_68, %c0_69] : memref<1x49x8x12xbf16, #tpu.memory_space<vmem>>, vector<1x1x8x12xbf16>
    %54 = vector.shape_cast %53 : vector<1x1x8x12xbf16> to vector<8x12xbf16>
    %cst_70 = arith.constant dense<0.000000e+00> : vector<8x280xf32>
    %55 = tpu.matmul %54, %52, %cst_70 {dimension_numbers = #tpu.dot_dimension_numbers<[1], [0], [0], [1], [0, 0, 1, 1], [], []>} : vector<8x12xbf16>, vector<12x280xbf16>, vector<8x280xf32> -> vector<8x280xf32>
    %56 = arith.addf %50, %55 : vector<8x280xf32>
    %c0_71 = arith.constant 0 : index
    %c0_72 = arith.constant 0 : index
    %c0_73 = arith.constant 0 : index
    %c22 = arith.constant 22 : index
    %57 = vector.load %arg2[%c0_71, %c0_72, %c0_73, %c22] : memref<1x1x12x406xbf16, #tpu.memory_space<vmem>>, vector<1x1x12x280xbf16>
    %58 = vector.shape_cast %57 : vector<1x1x12x280xbf16> to vector<12x280xbf16>
    %c0_74 = arith.constant 0 : index
    %c9 = arith.constant 9 : index
    %c0_75 = arith.constant 0 : index
    %c0_76 = arith.constant 0 : index
    %59 = vector.load %arg3[%c0_74, %c9, %c0_75, %c0_76] : memref<1x49x8x12xbf16, #tpu.memory_space<vmem>>, vector<1x1x8x12xbf16>
    %60 = vector.shape_cast %59 : vector<1x1x8x12xbf16> to vector<8x12xbf16>
    %cst_77 = arith.constant dense<0.000000e+00> : vector<8x280xf32>
    %61 = tpu.matmul %60, %58, %cst_77 {dimension_numbers = #tpu.dot_dimension_numbers<[1], [0], [0], [1], [0, 0, 1, 1], [], []>} : vector<8x12xbf16>, vector<12x280xbf16>, vector<8x280xf32> -> vector<8x280xf32>
    %62 = arith.addf %56, %61 : vector<8x280xf32>
    %c0_78 = arith.constant 0 : index
    %c0_79 = arith.constant 0 : index
    %c0_80 = arith.constant 0 : index
    %c23 = arith.constant 23 : index
    %63 = vector.load %arg2[%c0_78, %c0_79, %c0_80, %c23] : memref<1x1x12x406xbf16, #tpu.memory_space<vmem>>, vector<1x1x12x280xbf16>
    %64 = vector.shape_cast %63 : vector<1x1x12x280xbf16> to vector<12x280xbf16>
    %c0_81 = arith.constant 0 : index
    %c10 = arith.constant 10 : index
    %c0_82 = arith.constant 0 : index
    %c0_83 = arith.constant 0 : index
    %65 = vector.load %arg3[%c0_81, %c10, %c0_82, %c0_83] : memref<1x49x8x12xbf16, #tpu.memory_space<vmem>>, vector<1x1x8x12xbf16>
    %66 = vector.shape_cast %65 : vector<1x1x8x12xbf16> to vector<8x12xbf16>
    %cst_84 = arith.constant dense<0.000000e+00> : vector<8x280xf32>
    %67 = tpu.matmul %66, %64, %cst_84 {dimension_numbers = #tpu.dot_dimension_numbers<[1], [0], [0], [1], [0, 0, 1, 1], [], []>} : vector<8x12xbf16>, vector<12x280xbf16>, vector<8x280xf32> -> vector<8x280xf32>
    %68 = arith.addf %62, %67 : vector<8x280xf32>
    %c0_85 = arith.constant 0 : index
    %c0_86 = arith.constant 0 : index
    %c0_87 = arith.constant 0 : index
    %c24 = arith.constant 24 : index
    %69 = vector.load %arg2[%c0_85, %c0_86, %c0_87, %c24] : memref<1x1x12x406xbf16, #tpu.memory_space<vmem>>, vector<1x1x12x280xbf16>
    %70 = vector.shape_cast %69 : vector<1x1x12x280xbf16> to vector<12x280xbf16>
    %c0_88 = arith.constant 0 : index
    %c11 = arith.constant 11 : index
    %c0_89 = arith.constant 0 : index
    %c0_90 = arith.constant 0 : index
    %71 = vector.load %arg3[%c0_88, %c11, %c0_89, %c0_90] : memref<1x49x8x12xbf16, #tpu.memory_space<vmem>>, vector<1x1x8x12xbf16>
    %72 = vector.shape_cast %71 : vector<1x1x8x12xbf16> to vector<8x12xbf16>
    %cst_91 = arith.constant dense<0.000000e+00> : vector<8x280xf32>
    %73 = tpu.matmul %72, %70, %cst_91 {dimension_numbers = #tpu.dot_dimension_numbers<[1], [0], [0], [1], [0, 0, 1, 1], [], []>} : vector<8x12xbf16>, vector<12x280xbf16>, vector<8x280xf32> -> vector<8x280xf32>
    %74 = arith.addf %68, %73 : vector<8x280xf32>
    %c0_92 = arith.constant 0 : index
    %c0_93 = arith.constant 0 : index
    %c0_94 = arith.constant 0 : index
    %c25 = arith.constant 25 : index
    %75 = vector.load %arg2[%c0_92, %c0_93, %c0_94, %c25] : memref<1x1x12x406xbf16, #tpu.memory_space<vmem>>, vector<1x1x12x280xbf16>
    %76 = vector.shape_cast %75 : vector<1x1x12x280xbf16> to vector<12x280xbf16>
    %c0_95 = arith.constant 0 : index
    %c12 = arith.constant 12 : index
    %c0_96 = arith.constant 0 : index
    %c0_97 = arith.constant 0 : index
    %77 = vector.load %arg3[%c0_95, %c12, %c0_96, %c0_97] : memref<1x49x8x12xbf16, #tpu.memory_space<vmem>>, vector<1x1x8x12xbf16>
    %78 = vector.shape_cast %77 : vector<1x1x8x12xbf16> to vector<8x12xbf16>
    %cst_98 = arith.constant dense<0.000000e+00> : vector<8x280xf32>
    %79 = tpu.matmul %78, %76, %cst_98 {dimension_numbers = #tpu.dot_dimension_numbers<[1], [0], [0], [1], [0, 0, 1, 1], [], []>} : vector<8x12xbf16>, vector<12x280xbf16>, vector<8x280xf32> -> vector<8x280xf32>
    %80 = arith.addf %74, %79 : vector<8x280xf32>
    %c0_99 = arith.constant 0 : index
    %c0_100 = arith.constant 0 : index
    %c0_101 = arith.constant 0 : index
    %c26 = arith.constant 26 : index
    %81 = vector.load %arg2[%c0_99, %c0_100, %c0_101, %c26] : memref<1x1x12x406xbf16, #tpu.memory_space<vmem>>, vector<1x1x12x280xbf16>
    %82 = vector.shape_cast %81 : vector<1x1x12x280xbf16> to vector<12x280xbf16>
    %c0_102 = arith.constant 0 : index
    %c13 = arith.constant 13 : index
    %c0_103 = arith.constant 0 : index
    %c0_104 = arith.constant 0 : index
    %83 = vector.load %arg3[%c0_102, %c13, %c0_103, %c0_104] : memref<1x49x8x12xbf16, #tpu.memory_space<vmem>>, vector<1x1x8x12xbf16>
    %84 = vector.shape_cast %83 : vector<1x1x8x12xbf16> to vector<8x12xbf16>
    %cst_105 = arith.constant dense<0.000000e+00> : vector<8x280xf32>
    %85 = tpu.matmul %84, %82, %cst_105 {dimension_numbers = #tpu.dot_dimension_numbers<[1], [0], [0], [1], [0, 0, 1, 1], [], []>} : vector<8x12xbf16>, vector<12x280xbf16>, vector<8x280xf32> -> vector<8x280xf32>
    %86 = arith.addf %80, %85 : vector<8x280xf32>
    %c0_106 = arith.constant 0 : index
    %c0_107 = arith.constant 0 : index
    %c0_108 = arith.constant 0 : index
    %c40 = arith.constant 40 : index
    %87 = vector.load %arg2[%c0_106, %c0_107, %c0_108, %c40] : memref<1x1x12x406xbf16, #tpu.memory_space<vmem>>, vector<1x1x12x280xbf16>
    %88 = vector.shape_cast %87 : vector<1x1x12x280xbf16> to vector<12x280xbf16>
    %c0_109 = arith.constant 0 : index
    %c14 = arith.constant 14 : index
    %c0_110 = arith.constant 0 : index
    %c0_111 = arith.constant 0 : index
    %89 = vector.load %arg3[%c0_109, %c14, %c0_110, %c0_111] : memref<1x49x8x12xbf16, #tpu.memory_space<vmem>>, vector<1x1x8x12xbf16>
    %90 = vector.shape_cast %89 : vector<1x1x8x12xbf16> to vector<8x12xbf16>
    %cst_112 = arith.constant dense<0.000000e+00> : vector<8x280xf32>
    %91 = tpu.matmul %90, %88, %cst_112 {dimension_numbers = #tpu.dot_dimension_numbers<[1], [0], [0], [1], [0, 0, 1, 1], [], []>} : vector<8x12xbf16>, vector<12x280xbf16>, vector<8x280xf32> -> vector<8x280xf32>
    %92 = arith.addf %86, %91 : vector<8x280xf32>
    %c0_113 = arith.constant 0 : index
    %c0_114 = arith.constant 0 : index
    %c0_115 = arith.constant 0 : index
    %c41 = arith.constant 41 : index
    %93 = vector.load %arg2[%c0_113, %c0_114, %c0_115, %c41] : memref<1x1x12x406xbf16, #tpu.memory_space<vmem>>, vector<1x1x12x280xbf16>
    %94 = vector.shape_cast %93 : vector<1x1x12x280xbf16> to vector<12x280xbf16>
    %c0_116 = arith.constant 0 : index
    %c15 = arith.constant 15 : index
    %c0_117 = arith.constant 0 : index
    %c0_118 = arith.constant 0 : index
    %95 = vector.load %arg3[%c0_116, %c15, %c0_117, %c0_118] : memref<1x49x8x12xbf16, #tpu.memory_space<vmem>>, vector<1x1x8x12xbf16>
    %96 = vector.shape_cast %95 : vector<1x1x8x12xbf16> to vector<8x12xbf16>
    %cst_119 = arith.constant dense<0.000000e+00> : vector<8x280xf32>
    %97 = tpu.matmul %96, %94, %cst_119 {dimension_numbers = #tpu.dot_dimension_numbers<[1], [0], [0], [1], [0, 0, 1, 1], [], []>} : vector<8x12xbf16>, vector<12x280xbf16>, vector<8x280xf32> -> vector<8x280xf32>
    %98 = arith.addf %92, %97 : vector<8x280xf32>
    %c0_120 = arith.constant 0 : index
    %c0_121 = arith.constant 0 : index
    %c0_122 = arith.constant 0 : index
    %c42 = arith.constant 42 : index
    %99 = vector.load %arg2[%c0_120, %c0_121, %c0_122, %c42] : memref<1x1x12x406xbf16, #tpu.memory_space<vmem>>, vector<1x1x12x280xbf16>
    %100 = vector.shape_cast %99 : vector<1x1x12x280xbf16> to vector<12x280xbf16>
    %c0_123 = arith.constant 0 : index
    %c16 = arith.constant 16 : index
    %c0_124 = arith.constant 0 : index
    %c0_125 = arith.constant 0 : index
    %101 = vector.load %arg3[%c0_123, %c16, %c0_124, %c0_125] : memref<1x49x8x12xbf16, #tpu.memory_space<vmem>>, vector<1x1x8x12xbf16>
    %102 = vector.shape_cast %101 : vector<1x1x8x12xbf16> to vector<8x12xbf16>
    %cst_126 = arith.constant dense<0.000000e+00> : vector<8x280xf32>
    %103 = tpu.matmul %102, %100, %cst_126 {dimension_numbers = #tpu.dot_dimension_numbers<[1], [0], [0], [1], [0, 0, 1, 1], [], []>} : vector<8x12xbf16>, vector<12x280xbf16>, vector<8x280xf32> -> vector<8x280xf32>
    %104 = arith.addf %98, %103 : vector<8x280xf32>
    %c0_127 = arith.constant 0 : index
    %c0_128 = arith.constant 0 : index
    %c0_129 = arith.constant 0 : index
    %c43 = arith.constant 43 : index
    %105 = vector.load %arg2[%c0_127, %c0_128, %c0_129, %c43] : memref<1x1x12x406xbf16, #tpu.memory_space<vmem>>, vector<1x1x12x280xbf16>
    %106 = vector.shape_cast %105 : vector<1x1x12x280xbf16> to vector<12x280xbf16>
    %c0_130 = arith.constant 0 : index
    %c17 = arith.constant 17 : index
    %c0_131 = arith.constant 0 : index
    %c0_132 = arith.constant 0 : index
    %107 = vector.load %arg3[%c0_130, %c17, %c0_131, %c0_132] : memref<1x49x8x12xbf16, #tpu.memory_space<vmem>>, vector<1x1x8x12xbf16>
    %108 = vector.shape_cast %107 : vector<1x1x8x12xbf16> to vector<8x12xbf16>
    %cst_133 = arith.constant dense<0.000000e+00> : vector<8x280xf32>
    %109 = tpu.matmul %108, %106, %cst_133 {dimension_numbers = #tpu.dot_dimension_numbers<[1], [0], [0], [1], [0, 0, 1, 1], [], []>} : vector<8x12xbf16>, vector<12x280xbf16>, vector<8x280xf32> -> vector<8x280xf32>
    %110 = arith.addf %104, %109 : vector<8x280xf32>
    %c0_134 = arith.constant 0 : index
    %c0_135 = arith.constant 0 : index
    %c0_136 = arith.constant 0 : index
    %c44 = arith.constant 44 : index
    %111 = vector.load %arg2[%c0_134, %c0_135, %c0_136, %c44] : memref<1x1x12x406xbf16, #tpu.memory_space<vmem>>, vector<1x1x12x280xbf16>
    %112 = vector.shape_cast %111 : vector<1x1x12x280xbf16> to vector<12x280xbf16>
    %c0_137 = arith.constant 0 : index
    %c18 = arith.constant 18 : index
    %c0_138 = arith.constant 0 : index
    %c0_139 = arith.constant 0 : index
    %113 = vector.load %arg3[%c0_137, %c18, %c0_138, %c0_139] : memref<1x49x8x12xbf16, #tpu.memory_space<vmem>>, vector<1x1x8x12xbf16>
    %114 = vector.shape_cast %113 : vector<1x1x8x12xbf16> to vector<8x12xbf16>
    %cst_140 = arith.constant dense<0.000000e+00> : vector<8x280xf32>
    %115 = tpu.matmul %114, %112, %cst_140 {dimension_numbers = #tpu.dot_dimension_numbers<[1], [0], [0], [1], [0, 0, 1, 1], [], []>} : vector<8x12xbf16>, vector<12x280xbf16>, vector<8x280xf32> -> vector<8x280xf32>
    %116 = arith.addf %110, %115 : vector<8x280xf32>
    %c0_141 = arith.constant 0 : index
    %c0_142 = arith.constant 0 : index
    %c0_143 = arith.constant 0 : index
    %c45 = arith.constant 45 : index
    %117 = vector.load %arg2[%c0_141, %c0_142, %c0_143, %c45] : memref<1x1x12x406xbf16, #tpu.memory_space<vmem>>, vector<1x1x12x280xbf16>
    %118 = vector.shape_cast %117 : vector<1x1x12x280xbf16> to vector<12x280xbf16>
    %c0_144 = arith.constant 0 : index
    %c19 = arith.constant 19 : index
    %c0_145 = arith.constant 0 : index
    %c0_146 = arith.constant 0 : index
    %119 = vector.load %arg3[%c0_144, %c19, %c0_145, %c0_146] : memref<1x49x8x12xbf16, #tpu.memory_space<vmem>>, vector<1x1x8x12xbf16>
    %120 = vector.shape_cast %119 : vector<1x1x8x12xbf16> to vector<8x12xbf16>
    %cst_147 = arith.constant dense<0.000000e+00> : vector<8x280xf32>
    %121 = tpu.matmul %120, %118, %cst_147 {dimension_numbers = #tpu.dot_dimension_numbers<[1], [0], [0], [1], [0, 0, 1, 1], [], []>} : vector<8x12xbf16>, vector<12x280xbf16>, vector<8x280xf32> -> vector<8x280xf32>
    %122 = arith.addf %116, %121 : vector<8x280xf32>
    %c0_148 = arith.constant 0 : index
    %c0_149 = arith.constant 0 : index
    %c0_150 = arith.constant 0 : index
    %c46 = arith.constant 46 : index
    %123 = vector.load %arg2[%c0_148, %c0_149, %c0_150, %c46] : memref<1x1x12x406xbf16, #tpu.memory_space<vmem>>, vector<1x1x12x280xbf16>
    %124 = vector.shape_cast %123 : vector<1x1x12x280xbf16> to vector<12x280xbf16>
    %c0_151 = arith.constant 0 : index
    %c20_152 = arith.constant 20 : index
    %c0_153 = arith.constant 0 : index
    %c0_154 = arith.constant 0 : index
    %125 = vector.load %arg3[%c0_151, %c20_152, %c0_153, %c0_154] : memref<1x49x8x12xbf16, #tpu.memory_space<vmem>>, vector<1x1x8x12xbf16>
    %126 = vector.shape_cast %125 : vector<1x1x8x12xbf16> to vector<8x12xbf16>
    %cst_155 = arith.constant dense<0.000000e+00> : vector<8x280xf32>
    %127 = tpu.matmul %126, %124, %cst_155 {dimension_numbers = #tpu.dot_dimension_numbers<[1], [0], [0], [1], [0, 0, 1, 1], [], []>} : vector<8x12xbf16>, vector<12x280xbf16>, vector<8x280xf32> -> vector<8x280xf32>
    %128 = arith.addf %122, %127 : vector<8x280xf32>
    %c0_156 = arith.constant 0 : index
    %c0_157 = arith.constant 0 : index
    %c0_158 = arith.constant 0 : index
    %c60 = arith.constant 60 : index
    %129 = vector.load %arg2[%c0_156, %c0_157, %c0_158, %c60] : memref<1x1x12x406xbf16, #tpu.memory_space<vmem>>, vector<1x1x12x280xbf16>
    %130 = vector.shape_cast %129 : vector<1x1x12x280xbf16> to vector<12x280xbf16>
    %c0_159 = arith.constant 0 : index
    %c21_160 = arith.constant 21 : index
    %c0_161 = arith.constant 0 : index
    %c0_162 = arith.constant 0 : index
    %131 = vector.load %arg3[%c0_159, %c21_160, %c0_161, %c0_162] : memref<1x49x8x12xbf16, #tpu.memory_space<vmem>>, vector<1x1x8x12xbf16>
    %132 = vector.shape_cast %131 : vector<1x1x8x12xbf16> to vector<8x12xbf16>
    %cst_163 = arith.constant dense<0.000000e+00> : vector<8x280xf32>
    %133 = tpu.matmul %132, %130, %cst_163 {dimension_numbers = #tpu.dot_dimension_numbers<[1], [0], [0], [1], [0, 0, 1, 1], [], []>} : vector<8x12xbf16>, vector<12x280xbf16>, vector<8x280xf32> -> vector<8x280xf32>
    %134 = arith.addf %128, %133 : vector<8x280xf32>
    %c0_164 = arith.constant 0 : index
    %c0_165 = arith.constant 0 : index
    %c0_166 = arith.constant 0 : index
    %c61 = arith.constant 61 : index
    %135 = vector.load %arg2[%c0_164, %c0_165, %c0_166, %c61] : memref<1x1x12x406xbf16, #tpu.memory_space<vmem>>, vector<1x1x12x280xbf16>
    %136 = vector.shape_cast %135 : vector<1x1x12x280xbf16> to vector<12x280xbf16>
    %c0_167 = arith.constant 0 : index
    %c22_168 = arith.constant 22 : index
    %c0_169 = arith.constant 0 : index
    %c0_170 = arith.constant 0 : index
    %137 = vector.load %arg3[%c0_167, %c22_168, %c0_169, %c0_170] : memref<1x49x8x12xbf16, #tpu.memory_space<vmem>>, vector<1x1x8x12xbf16>
    %138 = vector.shape_cast %137 : vector<1x1x8x12xbf16> to vector<8x12xbf16>
    %cst_171 = arith.constant dense<0.000000e+00> : vector<8x280xf32>
    %139 = tpu.matmul %138, %136, %cst_171 {dimension_numbers = #tpu.dot_dimension_numbers<[1], [0], [0], [1], [0, 0, 1, 1], [], []>} : vector<8x12xbf16>, vector<12x280xbf16>, vector<8x280xf32> -> vector<8x280xf32>
    %140 = arith.addf %134, %139 : vector<8x280xf32>
    %c0_172 = arith.constant 0 : index
    %c0_173 = arith.constant 0 : index
    %c0_174 = arith.constant 0 : index
    %c62 = arith.constant 62 : index
    %141 = vector.load %arg2[%c0_172, %c0_173, %c0_174, %c62] : memref<1x1x12x406xbf16, #tpu.memory_space<vmem>>, vector<1x1x12x280xbf16>
    %142 = vector.shape_cast %141 : vector<1x1x12x280xbf16> to vector<12x280xbf16>
    %c0_175 = arith.constant 0 : index
    %c23_176 = arith.constant 23 : index
    %c0_177 = arith.constant 0 : index
    %c0_178 = arith.constant 0 : index
    %143 = vector.load %arg3[%c0_175, %c23_176, %c0_177, %c0_178] : memref<1x49x8x12xbf16, #tpu.memory_space<vmem>>, vector<1x1x8x12xbf16>
    %144 = vector.shape_cast %143 : vector<1x1x8x12xbf16> to vector<8x12xbf16>
    %cst_179 = arith.constant dense<0.000000e+00> : vector<8x280xf32>
    %145 = tpu.matmul %144, %142, %cst_179 {dimension_numbers = #tpu.dot_dimension_numbers<[1], [0], [0], [1], [0, 0, 1, 1], [], []>} : vector<8x12xbf16>, vector<12x280xbf16>, vector<8x280xf32> -> vector<8x280xf32>
    %146 = arith.addf %140, %145 : vector<8x280xf32>
    %c0_180 = arith.constant 0 : index
    %c0_181 = arith.constant 0 : index
    %c0_182 = arith.constant 0 : index
    %c63 = arith.constant 63 : index
    %147 = vector.load %arg2[%c0_180, %c0_181, %c0_182, %c63] : memref<1x1x12x406xbf16, #tpu.memory_space<vmem>>, vector<1x1x12x280xbf16>
    %148 = vector.shape_cast %147 : vector<1x1x12x280xbf16> to vector<12x280xbf16>
    %c0_183 = arith.constant 0 : index
    %c24_184 = arith.constant 24 : index
    %c0_185 = arith.constant 0 : index
    %c0_186 = arith.constant 0 : index
    %149 = vector.load %arg3[%c0_183, %c24_184, %c0_185, %c0_186] : memref<1x49x8x12xbf16, #tpu.memory_space<vmem>>, vector<1x1x8x12xbf16>
    %150 = vector.shape_cast %149 : vector<1x1x8x12xbf16> to vector<8x12xbf16>
    %cst_187 = arith.constant dense<0.000000e+00> : vector<8x280xf32>
    %151 = tpu.matmul %150, %148, %cst_187 {dimension_numbers = #tpu.dot_dimension_numbers<[1], [0], [0], [1], [0, 0, 1, 1], [], []>} : vector<8x12xbf16>, vector<12x280xbf16>, vector<8x280xf32> -> vector<8x280xf32>
    %152 = arith.addf %146, %151 : vector<8x280xf32>
    %c0_188 = arith.constant 0 : index
    %c0_189 = arith.constant 0 : index
    %c0_190 = arith.constant 0 : index
    %c64 = arith.constant 64 : index
    %153 = vector.load %arg2[%c0_188, %c0_189, %c0_190, %c64] : memref<1x1x12x406xbf16, #tpu.memory_space<vmem>>, vector<1x1x12x280xbf16>
    %154 = vector.shape_cast %153 : vector<1x1x12x280xbf16> to vector<12x280xbf16>
    %c0_191 = arith.constant 0 : index
    %c25_192 = arith.constant 25 : index
    %c0_193 = arith.constant 0 : index
    %c0_194 = arith.constant 0 : index
    %155 = vector.load %arg3[%c0_191, %c25_192, %c0_193, %c0_194] : memref<1x49x8x12xbf16, #tpu.memory_space<vmem>>, vector<1x1x8x12xbf16>
    %156 = vector.shape_cast %155 : vector<1x1x8x12xbf16> to vector<8x12xbf16>
    %cst_195 = arith.constant dense<0.000000e+00> : vector<8x280xf32>
    %157 = tpu.matmul %156, %154, %cst_195 {dimension_numbers = #tpu.dot_dimension_numbers<[1], [0], [0], [1], [0, 0, 1, 1], [], []>} : vector<8x12xbf16>, vector<12x280xbf16>, vector<8x280xf32> -> vector<8x280xf32>
    %158 = arith.addf %152, %157 : vector<8x280xf32>
    %c0_196 = arith.constant 0 : index
    %c0_197 = arith.constant 0 : index
    %c0_198 = arith.constant 0 : index
    %c65 = arith.constant 65 : index
    %159 = vector.load %arg2[%c0_196, %c0_197, %c0_198, %c65] : memref<1x1x12x406xbf16, #tpu.memory_space<vmem>>, vector<1x1x12x280xbf16>
    %160 = vector.shape_cast %159 : vector<1x1x12x280xbf16> to vector<12x280xbf16>
    %c0_199 = arith.constant 0 : index
    %c26_200 = arith.constant 26 : index
    %c0_201 = arith.constant 0 : index
    %c0_202 = arith.constant 0 : index
    %161 = vector.load %arg3[%c0_199, %c26_200, %c0_201, %c0_202] : memref<1x49x8x12xbf16, #tpu.memory_space<vmem>>, vector<1x1x8x12xbf16>
    %162 = vector.shape_cast %161 : vector<1x1x8x12xbf16> to vector<8x12xbf16>
    %cst_203 = arith.constant dense<0.000000e+00> : vector<8x280xf32>
    %163 = tpu.matmul %162, %160, %cst_203 {dimension_numbers = #tpu.dot_dimension_numbers<[1], [0], [0], [1], [0, 0, 1, 1], [], []>} : vector<8x12xbf16>, vector<12x280xbf16>, vector<8x280xf32> -> vector<8x280xf32>
    %164 = arith.addf %158, %163 : vector<8x280xf32>
    %c0_204 = arith.constant 0 : index
    %c0_205 = arith.constant 0 : index
    %c0_206 = arith.constant 0 : index
    %c66 = arith.constant 66 : index
    %165 = vector.load %arg2[%c0_204, %c0_205, %c0_206, %c66] : memref<1x1x12x406xbf16, #tpu.memory_space<vmem>>, vector<1x1x12x280xbf16>
    %166 = vector.shape_cast %165 : vector<1x1x12x280xbf16> to vector<12x280xbf16>
    %c0_207 = arith.constant 0 : index
    %c27 = arith.constant 27 : index
    %c0_208 = arith.constant 0 : index
    %c0_209 = arith.constant 0 : index
    %167 = vector.load %arg3[%c0_207, %c27, %c0_208, %c0_209] : memref<1x49x8x12xbf16, #tpu.memory_space<vmem>>, vector<1x1x8x12xbf16>
    %168 = vector.shape_cast %167 : vector<1x1x8x12xbf16> to vector<8x12xbf16>
    %cst_210 = arith.constant dense<0.000000e+00> : vector<8x280xf32>
    %169 = tpu.matmul %168, %166, %cst_210 {dimension_numbers = #tpu.dot_dimension_numbers<[1], [0], [0], [1], [0, 0, 1, 1], [], []>} : vector<8x12xbf16>, vector<12x280xbf16>, vector<8x280xf32> -> vector<8x280xf32>
    %170 = arith.addf %164, %169 : vector<8x280xf32>
    %c0_211 = arith.constant 0 : index
    %c0_212 = arith.constant 0 : index
    %c0_213 = arith.constant 0 : index
    %c80 = arith.constant 80 : index
    %171 = vector.load %arg2[%c0_211, %c0_212, %c0_213, %c80] : memref<1x1x12x406xbf16, #tpu.memory_space<vmem>>, vector<1x1x12x280xbf16>
    %172 = vector.shape_cast %171 : vector<1x1x12x280xbf16> to vector<12x280xbf16>
    %c0_214 = arith.constant 0 : index
    %c28 = arith.constant 28 : index
    %c0_215 = arith.constant 0 : index
    %c0_216 = arith.constant 0 : index
    %173 = vector.load %arg3[%c0_214, %c28, %c0_215, %c0_216] : memref<1x49x8x12xbf16, #tpu.memory_space<vmem>>, vector<1x1x8x12xbf16>
    %174 = vector.shape_cast %173 : vector<1x1x8x12xbf16> to vector<8x12xbf16>
    %cst_217 = arith.constant dense<0.000000e+00> : vector<8x280xf32>
    %175 = tpu.matmul %174, %172, %cst_217 {dimension_numbers = #tpu.dot_dimension_numbers<[1], [0], [0], [1], [0, 0, 1, 1], [], []>} : vector<8x12xbf16>, vector<12x280xbf16>, vector<8x280xf32> -> vector<8x280xf32>
    %176 = arith.addf %170, %175 : vector<8x280xf32>
    %c0_218 = arith.constant 0 : index
    %c0_219 = arith.constant 0 : index
    %c0_220 = arith.constant 0 : index
    %c81 = arith.constant 81 : index
    %177 = vector.load %arg2[%c0_218, %c0_219, %c0_220, %c81] : memref<1x1x12x406xbf16, #tpu.memory_space<vmem>>, vector<1x1x12x280xbf16>
    %178 = vector.shape_cast %177 : vector<1x1x12x280xbf16> to vector<12x280xbf16>
    %c0_221 = arith.constant 0 : index
    %c29 = arith.constant 29 : index
    %c0_222 = arith.constant 0 : index
    %c0_223 = arith.constant 0 : index
    %179 = vector.load %arg3[%c0_221, %c29, %c0_222, %c0_223] : memref<1x49x8x12xbf16, #tpu.memory_space<vmem>>, vector<1x1x8x12xbf16>
    %180 = vector.shape_cast %179 : vector<1x1x8x12xbf16> to vector<8x12xbf16>
    %cst_224 = arith.constant dense<0.000000e+00> : vector<8x280xf32>
    %181 = tpu.matmul %180, %178, %cst_224 {dimension_numbers = #tpu.dot_dimension_numbers<[1], [0], [0], [1], [0, 0, 1, 1], [], []>} : vector<8x12xbf16>, vector<12x280xbf16>, vector<8x280xf32> -> vector<8x280xf32>
    %182 = arith.addf %176, %181 : vector<8x280xf32>
    %c0_225 = arith.constant 0 : index
    %c0_226 = arith.constant 0 : index
    %c0_227 = arith.constant 0 : index
    %c82 = arith.constant 82 : index
    %183 = vector.load %arg2[%c0_225, %c0_226, %c0_227, %c82] : memref<1x1x12x406xbf16, #tpu.memory_space<vmem>>, vector<1x1x12x280xbf16>
    %184 = vector.shape_cast %183 : vector<1x1x12x280xbf16> to vector<12x280xbf16>
    %c0_228 = arith.constant 0 : index
    %c30 = arith.constant 30 : index
    %c0_229 = arith.constant 0 : index
    %c0_230 = arith.constant 0 : index
    %185 = vector.load %arg3[%c0_228, %c30, %c0_229, %c0_230] : memref<1x49x8x12xbf16, #tpu.memory_space<vmem>>, vector<1x1x8x12xbf16>
    %186 = vector.shape_cast %185 : vector<1x1x8x12xbf16> to vector<8x12xbf16>
    %cst_231 = arith.constant dense<0.000000e+00> : vector<8x280xf32>
    %187 = tpu.matmul %186, %184, %cst_231 {dimension_numbers = #tpu.dot_dimension_numbers<[1], [0], [0], [1], [0, 0, 1, 1], [], []>} : vector<8x12xbf16>, vector<12x280xbf16>, vector<8x280xf32> -> vector<8x280xf32>
    %188 = arith.addf %182, %187 : vector<8x280xf32>
    %c0_232 = arith.constant 0 : index
    %c0_233 = arith.constant 0 : index
    %c0_234 = arith.constant 0 : index
    %c83 = arith.constant 83 : index
    %189 = vector.load %arg2[%c0_232, %c0_233, %c0_234, %c83] : memref<1x1x12x406xbf16, #tpu.memory_space<vmem>>, vector<1x1x12x280xbf16>
    %190 = vector.shape_cast %189 : vector<1x1x12x280xbf16> to vector<12x280xbf16>
    %c0_235 = arith.constant 0 : index
    %c31 = arith.constant 31 : index
    %c0_236 = arith.constant 0 : index
    %c0_237 = arith.constant 0 : index
    %191 = vector.load %arg3[%c0_235, %c31, %c0_236, %c0_237] : memref<1x49x8x12xbf16, #tpu.memory_space<vmem>>, vector<1x1x8x12xbf16>
    %192 = vector.shape_cast %191 : vector<1x1x8x12xbf16> to vector<8x12xbf16>
    %cst_238 = arith.constant dense<0.000000e+00> : vector<8x280xf32>
    %193 = tpu.matmul %192, %190, %cst_238 {dimension_numbers = #tpu.dot_dimension_numbers<[1], [0], [0], [1], [0, 0, 1, 1], [], []>} : vector<8x12xbf16>, vector<12x280xbf16>, vector<8x280xf32> -> vector<8x280xf32>
    %194 = arith.addf %188, %193 : vector<8x280xf32>
    %c0_239 = arith.constant 0 : index
    %c0_240 = arith.constant 0 : index
    %c0_241 = arith.constant 0 : index
    %c84 = arith.constant 84 : index
    %195 = vector.load %arg2[%c0_239, %c0_240, %c0_241, %c84] : memref<1x1x12x406xbf16, #tpu.memory_space<vmem>>, vector<1x1x12x280xbf16>
    %196 = vector.shape_cast %195 : vector<1x1x12x280xbf16> to vector<12x280xbf16>
    %c0_242 = arith.constant 0 : index
    %c32 = arith.constant 32 : index
    %c0_243 = arith.constant 0 : index
    %c0_244 = arith.constant 0 : index
    %197 = vector.load %arg3[%c0_242, %c32, %c0_243, %c0_244] : memref<1x49x8x12xbf16, #tpu.memory_space<vmem>>, vector<1x1x8x12xbf16>
    %198 = vector.shape_cast %197 : vector<1x1x8x12xbf16> to vector<8x12xbf16>
    %cst_245 = arith.constant dense<0.000000e+00> : vector<8x280xf32>
    %199 = tpu.matmul %198, %196, %cst_245 {dimension_numbers = #tpu.dot_dimension_numbers<[1], [0], [0], [1], [0, 0, 1, 1], [], []>} : vector<8x12xbf16>, vector<12x280xbf16>, vector<8x280xf32> -> vector<8x280xf32>
    %200 = arith.addf %194, %199 : vector<8x280xf32>
    %c0_246 = arith.constant 0 : index
    %c0_247 = arith.constant 0 : index
    %c0_248 = arith.constant 0 : index
    %c85 = arith.constant 85 : index
    %201 = vector.load %arg2[%c0_246, %c0_247, %c0_248, %c85] : memref<1x1x12x406xbf16, #tpu.memory_space<vmem>>, vector<1x1x12x280xbf16>
    %202 = vector.shape_cast %201 : vector<1x1x12x280xbf16> to vector<12x280xbf16>
    %c0_249 = arith.constant 0 : index
    %c33 = arith.constant 33 : index
    %c0_250 = arith.constant 0 : index
    %c0_251 = arith.constant 0 : index
    %203 = vector.load %arg3[%c0_249, %c33, %c0_250, %c0_251] : memref<1x49x8x12xbf16, #tpu.memory_space<vmem>>, vector<1x1x8x12xbf16>
    %204 = vector.shape_cast %203 : vector<1x1x8x12xbf16> to vector<8x12xbf16>
    %cst_252 = arith.constant dense<0.000000e+00> : vector<8x280xf32>
    %205 = tpu.matmul %204, %202, %cst_252 {dimension_numbers = #tpu.dot_dimension_numbers<[1], [0], [0], [1], [0, 0, 1, 1], [], []>} : vector<8x12xbf16>, vector<12x280xbf16>, vector<8x280xf32> -> vector<8x280xf32>
    %206 = arith.addf %200, %205 : vector<8x280xf32>
    %c0_253 = arith.constant 0 : index
    %c0_254 = arith.constant 0 : index
    %c0_255 = arith.constant 0 : index
    %c86 = arith.constant 86 : index
    %207 = vector.load %arg2[%c0_253, %c0_254, %c0_255, %c86] : memref<1x1x12x406xbf16, #tpu.memory_space<vmem>>, vector<1x1x12x280xbf16>
    %208 = vector.shape_cast %207 : vector<1x1x12x280xbf16> to vector<12x280xbf16>
    %c0_256 = arith.constant 0 : index
    %c34 = arith.constant 34 : index
    %c0_257 = arith.constant 0 : index
    %c0_258 = arith.constant 0 : index
    %209 = vector.load %arg3[%c0_256, %c34, %c0_257, %c0_258] : memref<1x49x8x12xbf16, #tpu.memory_space<vmem>>, vector<1x1x8x12xbf16>
    %210 = vector.shape_cast %209 : vector<1x1x8x12xbf16> to vector<8x12xbf16>
    %cst_259 = arith.constant dense<0.000000e+00> : vector<8x280xf32>
    %211 = tpu.matmul %210, %208, %cst_259 {dimension_numbers = #tpu.dot_dimension_numbers<[1], [0], [0], [1], [0, 0, 1, 1], [], []>} : vector<8x12xbf16>, vector<12x280xbf16>, vector<8x280xf32> -> vector<8x280xf32>
    %212 = arith.addf %206, %211 : vector<8x280xf32>
    %c0_260 = arith.constant 0 : index
    %c0_261 = arith.constant 0 : index
    %c0_262 = arith.constant 0 : index
    %c100 = arith.constant 100 : index
    %213 = vector.load %arg2[%c0_260, %c0_261, %c0_262, %c100] : memref<1x1x12x406xbf16, #tpu.memory_space<vmem>>, vector<1x1x12x280xbf16>
    %214 = vector.shape_cast %213 : vector<1x1x12x280xbf16> to vector<12x280xbf16>
    %c0_263 = arith.constant 0 : index
    %c35 = arith.constant 35 : index
    %c0_264 = arith.constant 0 : index
    %c0_265 = arith.constant 0 : index
    %215 = vector.load %arg3[%c0_263, %c35, %c0_264, %c0_265] : memref<1x49x8x12xbf16, #tpu.memory_space<vmem>>, vector<1x1x8x12xbf16>
    %216 = vector.shape_cast %215 : vector<1x1x8x12xbf16> to vector<8x12xbf16>
    %cst_266 = arith.constant dense<0.000000e+00> : vector<8x280xf32>
    %217 = tpu.matmul %216, %214, %cst_266 {dimension_numbers = #tpu.dot_dimension_numbers<[1], [0], [0], [1], [0, 0, 1, 1], [], []>} : vector<8x12xbf16>, vector<12x280xbf16>, vector<8x280xf32> -> vector<8x280xf32>
    %218 = arith.addf %212, %217 : vector<8x280xf32>
    %c0_267 = arith.constant 0 : index
    %c0_268 = arith.constant 0 : index
    %c0_269 = arith.constant 0 : index
    %c101 = arith.constant 101 : index
    %219 = vector.load %arg2[%c0_267, %c0_268, %c0_269, %c101] : memref<1x1x12x406xbf16, #tpu.memory_space<vmem>>, vector<1x1x12x280xbf16>
    %220 = vector.shape_cast %219 : vector<1x1x12x280xbf16> to vector<12x280xbf16>
    %c0_270 = arith.constant 0 : index
    %c36 = arith.constant 36 : index
    %c0_271 = arith.constant 0 : index
    %c0_272 = arith.constant 0 : index
    %221 = vector.load %arg3[%c0_270, %c36, %c0_271, %c0_272] : memref<1x49x8x12xbf16, #tpu.memory_space<vmem>>, vector<1x1x8x12xbf16>
    %222 = vector.shape_cast %221 : vector<1x1x8x12xbf16> to vector<8x12xbf16>
    %cst_273 = arith.constant dense<0.000000e+00> : vector<8x280xf32>
    %223 = tpu.matmul %222, %220, %cst_273 {dimension_numbers = #tpu.dot_dimension_numbers<[1], [0], [0], [1], [0, 0, 1, 1], [], []>} : vector<8x12xbf16>, vector<12x280xbf16>, vector<8x280xf32> -> vector<8x280xf32>
    %224 = arith.addf %218, %223 : vector<8x280xf32>
    %c0_274 = arith.constant 0 : index
    %c0_275 = arith.constant 0 : index
    %c0_276 = arith.constant 0 : index
    %c102 = arith.constant 102 : index
    %225 = vector.load %arg2[%c0_274, %c0_275, %c0_276, %c102] : memref<1x1x12x406xbf16, #tpu.memory_space<vmem>>, vector<1x1x12x280xbf16>
    %226 = vector.shape_cast %225 : vector<1x1x12x280xbf16> to vector<12x280xbf16>
    %c0_277 = arith.constant 0 : index
    %c37 = arith.constant 37 : index
    %c0_278 = arith.constant 0 : index
    %c0_279 = arith.constant 0 : index
    %227 = vector.load %arg3[%c0_277, %c37, %c0_278, %c0_279] : memref<1x49x8x12xbf16, #tpu.memory_space<vmem>>, vector<1x1x8x12xbf16>
    %228 = vector.shape_cast %227 : vector<1x1x8x12xbf16> to vector<8x12xbf16>
    %cst_280 = arith.constant dense<0.000000e+00> : vector<8x280xf32>
    %229 = tpu.matmul %228, %226, %cst_280 {dimension_numbers = #tpu.dot_dimension_numbers<[1], [0], [0], [1], [0, 0, 1, 1], [], []>} : vector<8x12xbf16>, vector<12x280xbf16>, vector<8x280xf32> -> vector<8x280xf32>
    %230 = arith.addf %224, %229 : vector<8x280xf32>
    %c0_281 = arith.constant 0 : index
    %c0_282 = arith.constant 0 : index
    %c0_283 = arith.constant 0 : index
    %c103 = arith.constant 103 : index
    %231 = vector.load %arg2[%c0_281, %c0_282, %c0_283, %c103] : memref<1x1x12x406xbf16, #tpu.memory_space<vmem>>, vector<1x1x12x280xbf16>
    %232 = vector.shape_cast %231 : vector<1x1x12x280xbf16> to vector<12x280xbf16>
    %c0_284 = arith.constant 0 : index
    %c38 = arith.constant 38 : index
    %c0_285 = arith.constant 0 : index
    %c0_286 = arith.constant 0 : index
    %233 = vector.load %arg3[%c0_284, %c38, %c0_285, %c0_286] : memref<1x49x8x12xbf16, #tpu.memory_space<vmem>>, vector<1x1x8x12xbf16>
    %234 = vector.shape_cast %233 : vector<1x1x8x12xbf16> to vector<8x12xbf16>
    %cst_287 = arith.constant dense<0.000000e+00> : vector<8x280xf32>
    %235 = tpu.matmul %234, %232, %cst_287 {dimension_numbers = #tpu.dot_dimension_numbers<[1], [0], [0], [1], [0, 0, 1, 1], [], []>} : vector<8x12xbf16>, vector<12x280xbf16>, vector<8x280xf32> -> vector<8x280xf32>
    %236 = arith.addf %230, %235 : vector<8x280xf32>
    %c0_288 = arith.constant 0 : index
    %c0_289 = arith.constant 0 : index
    %c0_290 = arith.constant 0 : index
    %c104 = arith.constant 104 : index
    %237 = vector.load %arg2[%c0_288, %c0_289, %c0_290, %c104] : memref<1x1x12x406xbf16, #tpu.memory_space<vmem>>, vector<1x1x12x280xbf16>
    %238 = vector.shape_cast %237 : vector<1x1x12x280xbf16> to vector<12x280xbf16>
    %c0_291 = arith.constant 0 : index
    %c39 = arith.constant 39 : index
    %c0_292 = arith.constant 0 : index
    %c0_293 = arith.constant 0 : index
    %239 = vector.load %arg3[%c0_291, %c39, %c0_292, %c0_293] : memref<1x49x8x12xbf16, #tpu.memory_space<vmem>>, vector<1x1x8x12xbf16>
    %240 = vector.shape_cast %239 : vector<1x1x8x12xbf16> to vector<8x12xbf16>
    %cst_294 = arith.constant dense<0.000000e+00> : vector<8x280xf32>
    %241 = tpu.matmul %240, %238, %cst_294 {dimension_numbers = #tpu.dot_dimension_numbers<[1], [0], [0], [1], [0, 0, 1, 1], [], []>} : vector<8x12xbf16>, vector<12x280xbf16>, vector<8x280xf32> -> vector<8x280xf32>
    %242 = arith.addf %236, %241 : vector<8x280xf32>
    %c0_295 = arith.constant 0 : index
    %c0_296 = arith.constant 0 : index
    %c0_297 = arith.constant 0 : index
    %c105 = arith.constant 105 : index
    %243 = vector.load %arg2[%c0_295, %c0_296, %c0_297, %c105] : memref<1x1x12x406xbf16, #tpu.memory_space<vmem>>, vector<1x1x12x280xbf16>
    %244 = vector.shape_cast %243 : vector<1x1x12x280xbf16> to vector<12x280xbf16>
    %c0_298 = arith.constant 0 : index
    %c40_299 = arith.constant 40 : index
    %c0_300 = arith.constant 0 : index
    %c0_301 = arith.constant 0 : index
    %245 = vector.load %arg3[%c0_298, %c40_299, %c0_300, %c0_301] : memref<1x49x8x12xbf16, #tpu.memory_space<vmem>>, vector<1x1x8x12xbf16>
    %246 = vector.shape_cast %245 : vector<1x1x8x12xbf16> to vector<8x12xbf16>
    %cst_302 = arith.constant dense<0.000000e+00> : vector<8x280xf32>
    %247 = tpu.matmul %246, %244, %cst_302 {dimension_numbers = #tpu.dot_dimension_numbers<[1], [0], [0], [1], [0, 0, 1, 1], [], []>} : vector<8x12xbf16>, vector<12x280xbf16>, vector<8x280xf32> -> vector<8x280xf32>
    %248 = arith.addf %242, %247 : vector<8x280xf32>
    %c0_303 = arith.constant 0 : index
    %c0_304 = arith.constant 0 : index
    %c0_305 = arith.constant 0 : index
    %c106 = arith.constant 106 : index
    %249 = vector.load %arg2[%c0_303, %c0_304, %c0_305, %c106] : memref<1x1x12x406xbf16, #tpu.memory_space<vmem>>, vector<1x1x12x280xbf16>
    %250 = vector.shape_cast %249 : vector<1x1x12x280xbf16> to vector<12x280xbf16>
    %c0_306 = arith.constant 0 : index
    %c41_307 = arith.constant 41 : index
    %c0_308 = arith.constant 0 : index
    %c0_309 = arith.constant 0 : index
    %251 = vector.load %arg3[%c0_306, %c41_307, %c0_308, %c0_309] : memref<1x49x8x12xbf16, #tpu.memory_space<vmem>>, vector<1x1x8x12xbf16>
    %252 = vector.shape_cast %251 : vector<1x1x8x12xbf16> to vector<8x12xbf16>
    %cst_310 = arith.constant dense<0.000000e+00> : vector<8x280xf32>
    %253 = tpu.matmul %252, %250, %cst_310 {dimension_numbers = #tpu.dot_dimension_numbers<[1], [0], [0], [1], [0, 0, 1, 1], [], []>} : vector<8x12xbf16>, vector<12x280xbf16>, vector<8x280xf32> -> vector<8x280xf32>
    %254 = arith.addf %248, %253 : vector<8x280xf32>
    %c0_311 = arith.constant 0 : index
    %c0_312 = arith.constant 0 : index
    %c0_313 = arith.constant 0 : index
    %c120 = arith.constant 120 : index
    %255 = vector.load %arg2[%c0_311, %c0_312, %c0_313, %c120] : memref<1x1x12x406xbf16, #tpu.memory_space<vmem>>, vector<1x1x12x280xbf16>
    %256 = vector.shape_cast %255 : vector<1x1x12x280xbf16> to vector<12x280xbf16>
    %c0_314 = arith.constant 0 : index
    %c42_315 = arith.constant 42 : index
    %c0_316 = arith.constant 0 : index
    %c0_317 = arith.constant 0 : index
    %257 = vector.load %arg3[%c0_314, %c42_315, %c0_316, %c0_317] : memref<1x49x8x12xbf16, #tpu.memory_space<vmem>>, vector<1x1x8x12xbf16>
    %258 = vector.shape_cast %257 : vector<1x1x8x12xbf16> to vector<8x12xbf16>
    %cst_318 = arith.constant dense<0.000000e+00> : vector<8x280xf32>
    %259 = tpu.matmul %258, %256, %cst_318 {dimension_numbers = #tpu.dot_dimension_numbers<[1], [0], [0], [1], [0, 0, 1, 1], [], []>} : vector<8x12xbf16>, vector<12x280xbf16>, vector<8x280xf32> -> vector<8x280xf32>
    %260 = arith.addf %254, %259 : vector<8x280xf32>
    %c0_319 = arith.constant 0 : index
    %c0_320 = arith.constant 0 : index
    %c0_321 = arith.constant 0 : index
    %c121 = arith.constant 121 : index
    %261 = vector.load %arg2[%c0_319, %c0_320, %c0_321, %c121] : memref<1x1x12x406xbf16, #tpu.memory_space<vmem>>, vector<1x1x12x280xbf16>
    %262 = vector.shape_cast %261 : vector<1x1x12x280xbf16> to vector<12x280xbf16>
    %c0_322 = arith.constant 0 : index
    %c43_323 = arith.constant 43 : index
    %c0_324 = arith.constant 0 : index
    %c0_325 = arith.constant 0 : index
    %263 = vector.load %arg3[%c0_322, %c43_323, %c0_324, %c0_325] : memref<1x49x8x12xbf16, #tpu.memory_space<vmem>>, vector<1x1x8x12xbf16>
    %264 = vector.shape_cast %263 : vector<1x1x8x12xbf16> to vector<8x12xbf16>
    %cst_326 = arith.constant dense<0.000000e+00> : vector<8x280xf32>
    %265 = tpu.matmul %264, %262, %cst_326 {dimension_numbers = #tpu.dot_dimension_numbers<[1], [0], [0], [1], [0, 0, 1, 1], [], []>} : vector<8x12xbf16>, vector<12x280xbf16>, vector<8x280xf32> -> vector<8x280xf32>
    %266 = arith.addf %260, %265 : vector<8x280xf32>
    %c0_327 = arith.constant 0 : index
    %c0_328 = arith.constant 0 : index
    %c0_329 = arith.constant 0 : index
    %c122 = arith.constant 122 : index
    %267 = vector.load %arg2[%c0_327, %c0_328, %c0_329, %c122] : memref<1x1x12x406xbf16, #tpu.memory_space<vmem>>, vector<1x1x12x280xbf16>
    %268 = vector.shape_cast %267 : vector<1x1x12x280xbf16> to vector<12x280xbf16>
    %c0_330 = arith.constant 0 : index
    %c44_331 = arith.constant 44 : index
    %c0_332 = arith.constant 0 : index
    %c0_333 = arith.constant 0 : index
    %269 = vector.load %arg3[%c0_330, %c44_331, %c0_332, %c0_333] : memref<1x49x8x12xbf16, #tpu.memory_space<vmem>>, vector<1x1x8x12xbf16>
    %270 = vector.shape_cast %269 : vector<1x1x8x12xbf16> to vector<8x12xbf16>
    %cst_334 = arith.constant dense<0.000000e+00> : vector<8x280xf32>
    %271 = tpu.matmul %270, %268, %cst_334 {dimension_numbers = #tpu.dot_dimension_numbers<[1], [0], [0], [1], [0, 0, 1, 1], [], []>} : vector<8x12xbf16>, vector<12x280xbf16>, vector<8x280xf32> -> vector<8x280xf32>
    %272 = arith.addf %266, %271 : vector<8x280xf32>
    %c0_335 = arith.constant 0 : index
    %c0_336 = arith.constant 0 : index
    %c0_337 = arith.constant 0 : index
    %c123 = arith.constant 123 : index
    %273 = vector.load %arg2[%c0_335, %c0_336, %c0_337, %c123] : memref<1x1x12x406xbf16, #tpu.memory_space<vmem>>, vector<1x1x12x280xbf16>
    %274 = vector.shape_cast %273 : vector<1x1x12x280xbf16> to vector<12x280xbf16>
    %c0_338 = arith.constant 0 : index
    %c45_339 = arith.constant 45 : index
    %c0_340 = arith.constant 0 : index
    %c0_341 = arith.constant 0 : index
    %275 = vector.load %arg3[%c0_338, %c45_339, %c0_340, %c0_341] : memref<1x49x8x12xbf16, #tpu.memory_space<vmem>>, vector<1x1x8x12xbf16>
    %276 = vector.shape_cast %275 : vector<1x1x8x12xbf16> to vector<8x12xbf16>
    %cst_342 = arith.constant dense<0.000000e+00> : vector<8x280xf32>
    %277 = tpu.matmul %276, %274, %cst_342 {dimension_numbers = #tpu.dot_dimension_numbers<[1], [0], [0], [1], [0, 0, 1, 1], [], []>} : vector<8x12xbf16>, vector<12x280xbf16>, vector<8x280xf32> -> vector<8x280xf32>
    %278 = arith.addf %272, %277 : vector<8x280xf32>
    %c0_343 = arith.constant 0 : index
    %c0_344 = arith.constant 0 : index
    %c0_345 = arith.constant 0 : index
    %c124 = arith.constant 124 : index
    %279 = vector.load %arg2[%c0_343, %c0_344, %c0_345, %c124] : memref<1x1x12x406xbf16, #tpu.memory_space<vmem>>, vector<1x1x12x280xbf16>
    %280 = vector.shape_cast %279 : vector<1x1x12x280xbf16> to vector<12x280xbf16>
    %c0_346 = arith.constant 0 : index
    %c46_347 = arith.constant 46 : index
    %c0_348 = arith.constant 0 : index
    %c0_349 = arith.constant 0 : index
    %281 = vector.load %arg3[%c0_346, %c46_347, %c0_348, %c0_349] : memref<1x49x8x12xbf16, #tpu.memory_space<vmem>>, vector<1x1x8x12xbf16>
    %282 = vector.shape_cast %281 : vector<1x1x8x12xbf16> to vector<8x12xbf16>
    %cst_350 = arith.constant dense<0.000000e+00> : vector<8x280xf32>
    %283 = tpu.matmul %282, %280, %cst_350 {dimension_numbers = #tpu.dot_dimension_numbers<[1], [0], [0], [1], [0, 0, 1, 1], [], []>} : vector<8x12xbf16>, vector<12x280xbf16>, vector<8x280xf32> -> vector<8x280xf32>
    %284 = arith.addf %278, %283 : vector<8x280xf32>
    %c0_351 = arith.constant 0 : index
    %c0_352 = arith.constant 0 : index
    %c0_353 = arith.constant 0 : index
    %c125 = arith.constant 125 : index
    %285 = vector.load %arg2[%c0_351, %c0_352, %c0_353, %c125] : memref<1x1x12x406xbf16, #tpu.memory_space<vmem>>, vector<1x1x12x280xbf16>
    %286 = vector.shape_cast %285 : vector<1x1x12x280xbf16> to vector<12x280xbf16>
    %c0_354 = arith.constant 0 : index
    %c47 = arith.constant 47 : index
    %c0_355 = arith.constant 0 : index
    %c0_356 = arith.constant 0 : index
    %287 = vector.load %arg3[%c0_354, %c47, %c0_355, %c0_356] : memref<1x49x8x12xbf16, #tpu.memory_space<vmem>>, vector<1x1x8x12xbf16>
    %288 = vector.shape_cast %287 : vector<1x1x8x12xbf16> to vector<8x12xbf16>
    %cst_357 = arith.constant dense<0.000000e+00> : vector<8x280xf32>
    %289 = tpu.matmul %288, %286, %cst_357 {dimension_numbers = #tpu.dot_dimension_numbers<[1], [0], [0], [1], [0, 0, 1, 1], [], []>} : vector<8x12xbf16>, vector<12x280xbf16>, vector<8x280xf32> -> vector<8x280xf32>
    %290 = arith.addf %284, %289 : vector<8x280xf32>
    %c0_358 = arith.constant 0 : index
    %c0_359 = arith.constant 0 : index
    %c0_360 = arith.constant 0 : index
    %c126 = arith.constant 126 : index
    %291 = vector.load %arg2[%c0_358, %c0_359, %c0_360, %c126] : memref<1x1x12x406xbf16, #tpu.memory_space<vmem>>, vector<1x1x12x280xbf16>
    %292 = vector.shape_cast %291 : vector<1x1x12x280xbf16> to vector<12x280xbf16>
    %c0_361 = arith.constant 0 : index
    %c48 = arith.constant 48 : index
    %c0_362 = arith.constant 0 : index
    %c0_363 = arith.constant 0 : index
    %293 = vector.load %arg3[%c0_361, %c48, %c0_362, %c0_363] : memref<1x49x8x12xbf16, #tpu.memory_space<vmem>>, vector<1x1x8x12xbf16>
    %294 = vector.shape_cast %293 : vector<1x1x8x12xbf16> to vector<8x12xbf16>
    %cst_364 = arith.constant dense<0.000000e+00> : vector<8x280xf32>
    %295 = tpu.matmul %294, %292, %cst_364 {dimension_numbers = #tpu.dot_dimension_numbers<[1], [0], [0], [1], [0, 0, 1, 1], [], []>} : vector<8x12xbf16>, vector<12x280xbf16>, vector<8x280xf32> -> vector<8x280xf32>
    %296 = arith.addf %290, %295 : vector<8x280xf32>
    %c0_365 = arith.constant 0 : index
    %c0_366 = arith.constant 0 : index
    %c0_367 = arith.constant 0 : index
    %c0_368 = arith.constant 0 : index
    %297 = vector.load %arg5[%c0_365, %c0_366, %c0_367, %c0_368] : memref<1x1x8x280xf32, #tpu.memory_space<vmem>>, vector<1x1x8x280xf32>
    %298 = vector.shape_cast %297 : vector<1x1x8x280xf32> to vector<8x280xf32>
    %299 = vector.shape_cast %296 : vector<8x280xf32> to vector<1x1x8x280xf32>
    tpu.vector_store %arg5[%c0_365, %c0_366, %c0_367, %c0_368], %299 {strides = array<i32>} : memref<1x1x8x280xf32, #tpu.memory_space<vmem>>, vector<1x1x8x280xf32>,
    return
  }
  func.func @transform_0(%arg0: i32, %arg1: i32) -> (i32, i32, i32, i32) {
    %c0_i32 = arith.constant 0 : i32
    %c0_i32_0 = arith.constant 0 : i32
    %c0_i32_1 = arith.constant 0 : i32
    return %arg0, %arg1, %c0_i32, %c0_i32_0 : i32, i32, i32, i32
  }
  func.func @transform_1(%arg0: i32, %arg1: i32) -> (i32, i32, i32, i32) {
    %c0_i32 = arith.constant 0 : i32
    %c0_i32_0 = arith.constant 0 : i32
    %c0_i32_1 = arith.constant 0 : i32
    %c0_i32_2 = arith.constant 0 : i32
    return %arg1, %c0_i32, %c0_i32_0, %c0_i32_1 : i32, i32, i32, i32
  }
  func.func @transform_2(%arg0: i32, %arg1: i32) -> (i32, i32) {
    %c0_i32 = arith.constant 0 : i32
    %c0_i32_0 = arith.constant 0 : i32
    %c0_i32_1 = arith.constant 0 : i32
    return %c0_i32, %c0_i32_0 : i32, i32
  }
  func.func @transform_3(%arg0: i32, %arg1: i32) -> (i32, i32, i32, i32) {
    %c0_i32 = arith.constant 0 : i32
    %c0_i32_0 = arith.constant 0 : i32
    %c0_i32_1 = arith.constant 0 : i32
    return %arg0, %arg1, %c0_i32, %c0_i32_0 : i32, i32, i32, i32
  }
}

</mosaic_0001>

<bundles_post_ra>
// kernel: a_call__.1
= control target key start
LH: loop header
LB: loop body
LE: loop exit
PB: predicated region body
PF: predicated region fallthrough
CT: control target
= control target key end

     0   :  { %s6854_s12 = smov 0   ;;  %s6856_s13 = smov 0   ;;  %s7672_s0 = inlined_call_operand.vmem [shape: bf16[2,3,12,406], index: 0, kind: input, shape index: {}]   ;;  %s7673_s1 = inlined_call_operand.vmem [shape: bf16[3,49,8,12], index: 1, kind: input, shape index: {}]   ;;  %s7674_s2 = inlined_call_operand.vmem [shape: f32[8,1], index: 2, kind: input, shape index: {}]   ;;  %s7675_s3 = inlined_call_operand.vmem [shape: f32[2,3,8,280], index: 3, kind: output, shape index: {}]  }
   0x1   :  { %s6858_s14 = smov 0   ;;  %s6860_s15 = smov 0  }
   0x2   :  { %s6862_s16 = smov 0  }
   0x3 LB: > { %s22_s17 = sadd.s32 1, %s6773_s14  ;;  %s25_s18 = sadd.s32 1, %s6777_s15  ;;  %s6781_s16 = sphi %s6862_s16, %s13_s16   ;;  %s6777_s15 = sphi %s6860_s15, %s7679_s15   ;;  %s6773_s14 = sphi %s6858_s14, %s7678_s14   ;;  %s6769_s13 = sphi %s6856_s13, %s7677_s13   ;;  %s6765_s12 = sphi %s6854_s12, %s7676_s12  }
   0x4   : > { %p23_p0 = scmp.ge.s32.totalorder %s22_s17, 3  ;;  %p5648_p1 = scmp.ge.s32.totalorder %s6781_s16, 1 }
   0x5   : > { %p167_p2 = scmp.lt.s32.totalorder %s6781_s16, 7 }
   0x6   : > { %s7681_s17 = smov (%p23_p0, %s22_s17), 0  ;;  %s7683_s18 = smov (!%p23_p0, %s25_s18), %s6777_s15 }
   0x7   : > { %p168_p3 = pnand %p5648_p1, %p167_p2  ;;  %p27_p4 = scmp.ge.s32.totalorder %s7683_s18, 2 }
   0x8   : > { %p204_p5 = scmp.lt.s32.totalorder (!%p168_p3), %s6769_s13, 1  ;;  %p206_p6 = scmp.lt.s32.totalorder (!%p168_p3), %s6765_s12, 2  ;;  %v6783_v0 = vmov (!%p168_p3), 0.0   ;;  %vm6784_vm0 = vmmov (!%p168_p3), 0   ;;  %v6785_v1 = vmov (!%p168_p3), 0   ;;  %vm256_vm1 = vcmask (!%p168_p3), 1045504  }
   0x9   : > { %s7685_s18 = smov (%p27_p4, %s7683_s18), 0  ;;  %171 = sbr.rel (%p168_p3) target bundleno = 928 (0x3a0), region = 32 }
   0xa   : > { %5955 = vmatprep.subr.bf16.mxu1 (!%p168_p3), %v6783_v0  ;;  %5957 = vmatprep.mubr.msk.bf16.mxu1 (!%p168_p3), %vm6784_vm0, %v6783_v0  ;;  %s6786_s26 = smov (!%p168_p3), 127   ;;  %vm252_vm2 = vcmask (!%p168_p3), 97280   ;;  %s6787_s4 = smov (!%p168_p3), 126   ;;  %vm358_vm3 = vcmask (!%p168_p3), 1039360   ;;  %vm465_vm4 = vcmask (!%p168_p3), 1031168   ;;  %vm572_vm5 = vcmask (!%p168_p3), 1022976  }
   0xb   : > { %298 = vmatprep.mubr.bf16.mxu0 (!%p168_p3), %v6785_v1  ;;  %6731 = vset.pattern.permute.xlu1 (!%p168_p3), %v6785_v1  ;;  %s6788_s5 = smov (!%p168_p3), 125   ;;  %s6789_s6 = smov (!%p168_p3), 124   ;;  %vm679_vm6 = vcmask (!%p168_p3), 1014784   ;;  %vm786_vm7 = vcmask (!%p168_p3), 1006592   ;;  %vm893_vm8 = vcmask (!%p168_p3), 998400   ;;  %vm1000_vm9 = vcmask (!%p168_p3), 883712  }
   0xc   : > { %6732 = vset.pattern.permute.xlu0 (!%p168_p3), %v6785_v1  ;;  %s6790_s7 = smov (!%p168_p3), 123   ;;  %s6791_s8 = smov (!%p168_p3), 122   ;;  %vm1107_vm10 = vcmask (!%p168_p3), 875520   ;;  %vm1214_vm11 = vcmask (!%p168_p3), 867328   ;;  %vm1321_vm12 = vcmask (!%p168_p3), 859136   ;;  %vm1428_vm13 = vcmask (!%p168_p3), 850944  }
   0xd   : > { %s6792_s9 = smov (!%p168_p3), 108   ;;  %s6793_s10 = smov (!%p168_p3), 107   ;;  %vm1535_vm14 = vcmask (!%p168_p3), 842752   ;;  %vm1642_vm15 = vcmask (!%p168_p3), 834560  }
   0xe   : > { %s6794_s11 = smov (!%p168_p3), 106   ;;  %s6799_s23 = smov (!%p168_p3), 88  }
   0xf   : > { %s6800_s24 = smov (!%p168_p3), 87   ;;  %s6803_s28 = smov (!%p168_p3), 84  }
  0x10   : > { %s7687_s13 = smov (!%p204_p5, %s6769_s13), 1  ;;  %s7689_s12 = smov (!%p206_p6, %s6765_s12), 2 }
  0x11   : > { %s6636_s19 = smul.u32 24, %s7687_s13  ;;  %s5649_s20 = sshll.u32 %s7689_s12, 3 }
  0x12   : > { %s6637_s27 = smul.u32 196, %s7689_s12  ;;  %s6804_s29 = smov 83  }
  0x13   : > { %s210_s21 = sadd.s32 %s6636_s19, %s5649_s20  ;;  %s6795_s19 = smov 105  }
  0x14   : > { %s5650_s22 = sshll.u32 %s210_s21, 2  ;;  %s6920_s30 = scalar_lea.vmem %s7673_s1, %s6637_s27 }
  0x15   : > { %s6899_s25 = scalar_lea.vmem %s7672_s0, %s5650_s22  ;;  %v238_v7 = vld [vmem:[%s6920_s30] sm:$0xf]  ;;  %s6796_s20 = smov 104   ;;  %v5659_v11 = vld [vmem:[%s6920_s30 + $0x4] sm:$0xf] }
  0x16   : > { %v6902_v2 = vld [vmem:[%s6899_s25 + $0x8] ss:$16 sps:$4 sm:$0x3f]   ;;  %v6905_v3 = vld [vmem:[%s6899_s25] ss:$16 sps:$4 sm:$0x3f]  }
  0x17   : > { %v6908_v4 = vld [vmem:[%s6899_s25 + $0x4] ss:$16 sps:$4 sm:$0x3f]   ;;  %356 = vrot.lane.b32.xlu1 %v6902_v2, %s6786_s26  ;;  %v264_v5 = vsel %vm256_vm1, %v6902_v2, 0  ;;  %352 = vrot.lane.b32.xlu0 %v6905_v3, %s6786_s26  ;;  %v258_v6 = vsel %vm256_vm1, %v6905_v3, 0  ;;  %s6797_s21 = smov 103  }
  0x18   : > { %5956 = vmatpush3.bf16.msra.mxu1 %v264_v5  ;;  %5656 = vmatprep.subr.msk.bf16.mxu0 %vm256_vm1, %v6908_v4  ;;  %s6798_s22 = smov 102   ;;  %s6802_s27 = smov 85   ;;  %v5663_v25 = vld [vmem:[%s6920_s30 + $0x8] sm:$0xf]  ;;  %v5667_v36 = vld [vmem:[%s6920_s30 + $0xc] sm:$0xf] }
  0x19   : > { %5961 = vmatprep.subr.bf16.mxu1 %v6783_v0  ;;  %267 = vmatpush1.bf16.msra.mxu0 %v258_v6  ;;  %v5671_v44 = vld [vmem:[%s6920_s30 + $0x10] sm:$0xf]  ;;  %v5675_v52 = vld [vmem:[%s6920_s30 + $0x14] sm:$0xf]  ;;  %v5679_v60 = vld [vmem:[%s6920_s30 + $0x18] sm:$0xf] }
  0x1b   : > { %459 = vrot.lane.b32.xlu1 %v6905_v3, %s6787_s4  ;;  %5958 = vmatmul.mubr.msk.bf16.vlgmr.msra.gmra.mrb[0].mxu1 %vm252_vm2, %v238_v7 }
  0x1c   : > { %354 = vrot.lane.b32.xlu0 %v6908_v4, %s6786_s26  ;;  %5963 = vmatprep.mubr.msk.bf16.mxu1 %vm6784_vm0, %v6783_v0  ;;  %s6801_s26 = smov 86  }
  0x1d   : > { %5657 = vmatmul.mubr.msk.bf16.vlgmr.msra.gmra.mrb[0].mxu0 %vm252_vm2, %v238_v7 }
  0x1e   : > { %405 = vmatprep.mubr.bf16.mxu0 %v6785_v1 }
  0x1f   : > { %463 = vrot.lane.b32.xlu1 %v6902_v2, %s6787_s4 }
  0x20   : > { %461 = vrot.lane.b32.xlu0 %v6908_v4, %s6787_s4  ;;  %s6805_s4 = smov 82  }
  0x23   : > { %568 = vrot.lane.b32.xlu1 %v6908_v4, %s6788_s5 }
  0x24   : > { %566 = vrot.lane.b32.xlu0 %v6905_v3, %s6788_s5 }
  0x27   : > { %673 = vrot.lane.b32.xlu1 %v6905_v3, %s6789_s6 }
  0x28   : > { %570 = vrot.lane.b32.xlu0 %v6902_v2, %s6788_s5  ;;  %s6806_s5 = smov 68  }
  0x2b   : > { %677 = vrot.lane.b32.xlu1 %v6902_v2, %s6789_s6 }
  0x2c   : > { %675 = vrot.lane.b32.xlu0 %v6908_v4, %s6789_s6  ;;  %s6807_s6 = smov 67  }
  0x2f   : > { %782 = vrot.lane.b32.xlu1 %v6908_v4, %s6790_s7 }
  0x30   : > { %780 = vrot.lane.b32.xlu0 %v6905_v3, %s6790_s7 }
  0x33   : > { %887 = vrot.lane.b32.xlu1 %v6905_v3, %s6791_s8 }
  0x34   : > { %784 = vrot.lane.b32.xlu0 %v6902_v2, %s6790_s7  ;;  %s6808_s7 = smov 66  }
  0x37   : > { %891 = vrot.lane.b32.xlu1 %v6902_v2, %s6791_s8 }
  0x38   : > { %889 = vrot.lane.b32.xlu0 %v6908_v4, %s6791_s8  ;;  %s6809_s8 = smov 65  }
  0x3b   : > { %996 = vrot.lane.b32.xlu1 %v6908_v4, %s6792_s9 }
  0x3c   : > { %994 = vrot.lane.b32.xlu0 %v6905_v3, %s6792_s9 }
  0x3f   : > { %1101 = vrot.lane.b32.xlu1 %v6905_v3, %s6793_s10 }
  0x40   : > { %998 = vrot.lane.b32.xlu0 %v6902_v2, %s6792_s9  ;;  %s6810_s9 = smov 64  }
  0x43   : > { %1105 = vrot.lane.b32.xlu1 %v6902_v2, %s6793_s10 }
  0x44   : > { %1103 = vrot.lane.b32.xlu0 %v6908_v4, %s6793_s10  ;;  %s6811_s10 = smov 63  }
  0x47   : > { %1210 = vrot.lane.b32.xlu1 %v6908_v4, %s6794_s11 }
  0x48   : > { %1208 = vrot.lane.b32.xlu0 %v6905_v3, %s6794_s11 }
  0x4b   : > { %1315 = vrot.lane.b32.xlu1 %v6905_v3, %s6795_s19 }
  0x4c   : > { %1212 = vrot.lane.b32.xlu0 %v6902_v2, %s6794_s11  ;;  %s6812_s11 = smov 62  }
  0x4f   : > { %1319 = vrot.lane.b32.xlu1 %v6902_v2, %s6795_s19 }
  0x50   : > { %1317 = vrot.lane.b32.xlu0 %v6908_v4, %s6795_s19  ;;  %s6813_s19 = smov 48  }
  0x53   : > { %1424 = vrot.lane.b32.xlu1 %v6908_v4, %s6796_s20 }
  0x54   : > { %1422 = vrot.lane.b32.xlu0 %v6905_v3, %s6796_s20 }
  0x57   : > { %1529 = vrot.lane.b32.xlu1 %v6905_v3, %s6797_s21 }
  0x58   : > { %1426 = vrot.lane.b32.xlu0 %v6902_v2, %s6796_s20  ;;  %s6814_s20 = smov 47  }
  0x5b   : > { %1533 = vrot.lane.b32.xlu1 %v6902_v2, %s6797_s21 }
  0x5c   : > { %1531 = vrot.lane.b32.xlu0 %v6908_v4, %s6797_s21  ;;  %s6815_s21 = smov 46  }
  0x5f   : > { %1638 = vrot.lane.b32.xlu1 %v6908_v4, %s6798_s22 }
  0x60   : > { %1636 = vrot.lane.b32.xlu0 %v6905_v3, %s6798_s22 }
  0x63   : > { %1743 = vrot.lane.b32.xlu1 %v6905_v3, %s6799_s23 }
  0x64   : > { %1640 = vrot.lane.b32.xlu0 %v6902_v2, %s6798_s22  ;;  %s6816_s22 = smov 45  }
  0x67   : > { %1747 = vrot.lane.b32.xlu1 %v6902_v2, %s6799_s23 }
  0x68   : > { %1745 = vrot.lane.b32.xlu0 %v6908_v4, %s6799_s23  ;;  %s6817_s23 = smov 44  }
  0x6b   : > { %1852 = vrot.lane.b32.xlu1 %v6908_v4, %s6800_s24 }
  0x6c   : > { %1850 = vrot.lane.b32.xlu0 %v6905_v3, %s6800_s24 }
  0x6f   : > { %1957 = vrot.lane.b32.xlu1 %v6905_v3, %s6801_s26 }
  0x70   : > { %1854 = vrot.lane.b32.xlu0 %v6902_v2, %s6800_s24  ;;  %s6818_s24 = smov 43  }
  0x73   : > { %1961 = vrot.lane.b32.xlu1 %v6902_v2, %s6801_s26 }
  0x74   : > { %1959 = vrot.lane.b32.xlu0 %v6908_v4, %s6801_s26  ;;  %s6819_s26 = smov 42  }
  0x77   : > { %2066 = vrot.lane.b32.xlu1 %v6908_v4, %s6802_s27 }
  0x78   : > { %2064 = vrot.lane.b32.xlu0 %v6905_v3, %s6802_s27 }
  0x7b   : > { %2171 = vrot.lane.b32.xlu1 %v6905_v3, %s6803_s28 }
  0x7c   : > { %2068 = vrot.lane.b32.xlu0 %v6902_v2, %s6802_s27  ;;  %s6820_s27 = smov 28  }
  0x7f   : > { %2175 = vrot.lane.b32.xlu1 %v6902_v2, %s6803_s28 }
  0x80   : > { %2173 = vrot.lane.b32.xlu0 %v6908_v4, %s6803_s28  ;;  %s6821_s28 = smov 27  }
  0x83   : > { %2280 = vrot.lane.b32.xlu1 %v6908_v4, %s6804_s29 }
  0x84   : > { %2278 = vrot.lane.b32.xlu0 %v6905_v3, %s6804_s29 }
  0x87   : > { %2385 = vrot.lane.b32.xlu1 %v6905_v3, %s6805_s4 }
  0x88   : > { %2282 = vrot.lane.b32.xlu0 %v6902_v2, %s6804_s29  ;;  %s6822_s29 = smov 26  }
  0x89   : > { %v357_v8 = vpop.permute.xlu1 %356  ;;  %v353_v9 = vpop.permute.xlu0 %352 }
  0x8a   : > { %v371_v10 = vsel %vm256_vm1, %v357_v8, 0 }
  0x8b   : > { %5962 = vmatpush3.bf16.msra.mxu1 %v371_v10  ;;  %2389 = vrot.lane.b32.xlu1 %v6902_v2, %s6805_s4 }
  0x8c   : > { %5967 = vmatprep.subr.bf16.mxu1 %v6783_v0  ;;  %2387 = vrot.lane.b32.xlu0 %v6908_v4, %s6805_s4  ;;  %s6823_s4 = smov 25  }
  0x8d   : > { %v460_v12 = vpop.permute.xlu1 %459 }
  0x8e   : > { %v355_v13 = vpop.permute.xlu0 %354  ;;  %5964 = vmatmul.mubr.msk.bf16.vlgmr.msra.gmra.mrb[0].mxu1 %vm252_vm2, %v5659_v11 }
  0x8f   : > { %v359_v14 = vsel %vm358_vm3, %v353_v9, %v355_v13  ;;  %v360_v15 = vsel %vm358_vm3, %v355_v13, %v357_v8  ;;  %5969 = vmatprep.mubr.msk.bf16.mxu1 %vm6784_vm0, %v6783_v0  ;;  %2494 = vrot.lane.b32.xlu1 %v6908_v4, %s6806_s5  ;;  %v5683_v9 = vld [vmem:[%s6920_s30 + $0x1c] sm:$0xf]  ;;  %vm1749_vm3 = vcmask 719872  }
  0x90   : > { %5660 = vmatprep.subr.msk.bf16.mxu0 %vm256_vm1, %v360_v15  ;;  %v365_v16 = vsel %vm256_vm1, %v359_v14, 0  ;;  %2492 = vrot.lane.b32.xlu0 %v6905_v3, %s6806_s5 }
  0x91   : > { %374 = vmatpush1.bf16.msra.mxu0 %v365_v16  ;;  %v464_v17 = vpop.permute.xlu1 %463 }
  0x92   : > { %v462_v18 = vpop.permute.xlu0 %461  ;;  %v478_v19 = vsel %vm256_vm1, %v464_v17, 0 }
  0x93   : > { %v466_v20 = vsel %vm465_vm4, %v460_v12, %v462_v18  ;;  %v467_v21 = vsel %vm465_vm4, %v462_v18, %v464_v17  ;;  %5968 = vmatpush3.bf16.msra.mxu1 %v478_v19  ;;  %2599 = vrot.lane.b32.xlu1 %v6905_v3, %s6807_s6  ;;  %v5687_v17 = vld [vmem:[%s6920_s30 + $0x20] sm:$0xf]  ;;  %vm1856_vm4 = vcmask 711680  }
  0x94   : > { %5661 = vmatmul.mubr.msk.bf16.vlgmr.msra.gmra.mrb[0].mxu0 %vm252_vm2, %v5659_v11  ;;  %5664 = vmatprep.subr.msk.bf16.mxu0 %vm256_vm1, %v467_v21  ;;  %v472_v22 = vsel %vm256_vm1, %v466_v20, 0 }
  0x95   : > { %481 = vmatpush1.bf16.msra.mxu0 %v472_v22  ;;  %512 = vmatprep.mubr.bf16.mxu0 %v6785_v1  ;;  %v569_v23 = vpop.permute.xlu1 %568 }
  0x96   : > { %v567_v24 = vpop.permute.xlu0 %566  ;;  %5973 = vmatprep.subr.bf16.mxu1 %v6783_v0  ;;  %2496 = vrot.lane.b32.xlu0 %v6902_v2, %s6806_s5  ;;  %s6824_s5 = smov 24  }
  0x97   : > { %2603 = vrot.lane.b32.xlu1 %v6902_v2, %s6807_s6  ;;  %v573_v28 = vsel %vm572_vm5, %v567_v24, %v569_v23 }
  0x98   : > { %v579_v32 = vsel %vm256_vm1, %v573_v28, 0 }
  0x99   : > { %v674_v26 = vpop.permute.xlu1 %673 }
  0x9a   : > { %5970 = vmatmul.mubr.msk.bf16.vlgmr.msra.gmra.mrb[0].mxu1 %vm252_vm2, %v5663_v25  ;;  %v571_v27 = vpop.permute.xlu0 %570  ;;  %2601 = vrot.lane.b32.xlu0 %v6908_v4, %s6807_s6  ;;  %s6825_s6 = smov 23  }
  0x9b   : > { %v574_v29 = vsel %vm572_vm5, %v569_v23, %v571_v27  ;;  %v585_v30 = vsel %vm256_vm1, %v571_v27, 0  ;;  %5975 = vmatprep.mubr.msk.bf16.mxu1 %vm6784_vm0, %v6783_v0  ;;  %2708 = vrot.lane.b32.xlu1 %v6908_v4, %s6808_s7  ;;  %vm1963_vm5 = vcmask 703488  }
  0x9c   : > { %5668 = vmatprep.subr.msk.bf16.mxu0 %vm256_vm1, %v574_v29  ;;  %5974 = vmatpush3.bf16.msra.mxu1 %v585_v30 }
  0x9d   : > { %v678_v31 = vpop.permute.xlu1 %677  ;;  %5979 = vmatprep.subr.bf16.mxu1 %v6783_v0 }
  0x9e   : > { %v676_v33 = vpop.permute.xlu0 %675  ;;  %2706 = vrot.lane.b32.xlu0 %v6905_v3, %s6808_s7  ;;  %v692_v37 = vsel %vm256_vm1, %v678_v31, 0 }
  0x9f   : > { %v681_v34 = vsel %vm679_vm6, %v676_v33, %v678_v31  ;;  %2813 = vrot.lane.b32.xlu1 %v6905_v3, %s6809_s8  ;;  %v680_v38 = vsel %vm679_vm6, %v674_v26, %v676_v33  ;;  %v5695_v33 = vld [vmem:[%s6920_s30 + $0x28] sm:$0xf]  ;;  %vm2070_vm6 = vcmask 695296  }
  0xa0   : > { %5665 = vmatmul.mubr.msk.bf16.vlgmr.msra.gmra.mrb[0].mxu0 %vm252_vm2, %v5663_v25  ;;  %v686_v41 = vsel %vm256_vm1, %v680_v38, 0  ;;  %v5691_v25 = vld [vmem:[%s6920_s30 + $0x24] sm:$0xf] }
  0xa1   : > { %588 = vmatpush1.bf16.msra.mxu0 %v579_v32  ;;  %619 = vmatprep.mubr.bf16.mxu0 %v6785_v1  ;;  %v783_v39 = vpop.permute.xlu1 %782 }
  0xa2   : > { %5672 = vmatprep.subr.msk.bf16.mxu0 %vm256_vm1, %v681_v34  ;;  %v781_v35 = vpop.permute.xlu0 %780  ;;  %2710 = vrot.lane.b32.xlu0 %v6902_v2, %s6808_s7  ;;  %s6827_s7 = smov 8  }
  0xa3   : > { %2817 = vrot.lane.b32.xlu1 %v6902_v2, %s6809_s8  ;;  %v787_v46 = vsel %vm786_vm7, %v781_v35, %v783_v39 }
  0xa4   : > { %v793_v49 = vsel %vm256_vm1, %v787_v46, 0 }
  0xa5   : > { %v888_v43 = vpop.permute.xlu1 %887 }
  0xa6   : > { %5976 = vmatmul.mubr.msk.bf16.vlgmr.msra.gmra.mrb[0].mxu1 %vm252_vm2, %v5667_v36  ;;  %2815 = vrot.lane.b32.xlu0 %v6908_v4, %s6809_s8  ;;  %v785_v40 = vpop.permute.xlu0 %784  ;;  %s6828_s8 = smov 7  }
  0xa7   : > { %5980 = vmatpush3.bf16.msra.mxu1 %v692_v37  ;;  %5981 = vmatprep.mubr.msk.bf16.mxu1 %vm6784_vm0, %v6783_v0  ;;  %v788_v42 = vsel %vm786_vm7, %v783_v39, %v785_v40  ;;  %v799_v45 = vsel %vm256_vm1, %v785_v40, 0  ;;  %vm2177_vm7 = vcmask 687104  }
  0xa8   : > { %5985 = vmatprep.subr.bf16.mxu1 %v6783_v0  ;;  %2922 = vrot.lane.b32.xlu1 %v6908_v4, %s6810_s9 }
  0xa9   : > { %v892_v47 = vpop.permute.xlu1 %891 }
  0xaa   : > { %2920 = vrot.lane.b32.xlu0 %v6905_v3, %s6810_s9  ;;  %v890_v48 = vpop.permute.xlu0 %889  ;;  %v906_v53 = vsel %vm256_vm1, %v892_v47, 0 }
  0xab   : > { %v895_v50 = vsel %vm893_vm8, %v890_v48, %v892_v47  ;;  %v894_v54 = vsel %vm893_vm8, %v888_v43, %v890_v48  ;;  %vm2284_vm8 = vcmask 678912  }
  0xac   : > { %5669 = vmatmul.mubr.msk.bf16.vlgmr.msra.gmra.mrb[0].mxu0 %vm252_vm2, %v5667_v36  ;;  %3027 = vrot.lane.b32.xlu1 %v6905_v3, %s6811_s10  ;;  %v900_v57 = vsel %vm256_vm1, %v894_v54, 0 }
  0xad   : > { %695 = vmatpush1.bf16.msra.mxu0 %v686_v41  ;;  %726 = vmatprep.mubr.bf16.mxu0 %v6785_v1  ;;  %v997_v55 = vpop.permute.xlu1 %996  ;;  %v5699_v41 = vld [vmem:[%s6920_s30 + $0x2c] sm:$0xf] }
  0xae   : > { %5676 = vmatprep.subr.msk.bf16.mxu0 %vm256_vm1, %v788_v42  ;;  %2924 = vrot.lane.b32.xlu0 %v6902_v2, %s6810_s9  ;;  %v995_v51 = vpop.permute.xlu0 %994  ;;  %s6829_s9 = smov 6  }
  0xaf   : > { %v1001_v62 = vsel %vm1000_vm9, %v995_v51, %v997_v55 }
  0xb0   : > { %3031 = vrot.lane.b32.xlu1 %v6902_v2, %s6811_s10  ;;  %v1007_v6 = vsel %vm256_vm1, %v1001_v62, 0 }
  0xb1   : > { %v1102_v59 = vpop.permute.xlu1 %1101 }
  0xb2   : > { %5982 = vmatmul.mubr.msk.bf16.vlgmr.msra.gmra.mrb[0].mxu1 %vm252_vm2, %v5671_v44  ;;  %3029 = vrot.lane.b32.xlu0 %v6908_v4, %s6811_s10  ;;  %v999_v56 = vpop.permute.xlu0 %998  ;;  %s6830_s10 = smov 5  }
  0xb3   : > { %5986 = vmatpush3.bf16.msra.mxu1 %v799_v45  ;;  %5987 = vmatprep.mubr.msk.bf16.mxu1 %vm6784_vm0, %v6783_v0  ;;  %v1002_v58 = vsel %vm1000_vm9, %v997_v55, %v999_v56  ;;  %v1013_v61 = vsel %vm256_vm1, %v999_v56, 0  ;;  %vm2391_vm9 = vcmask 670720  }
  0xb4   : > { %5991 = vmatprep.subr.bf16.mxu1 %v6783_v0  ;;  %3136 = vrot.lane.b32.xlu1 %v6908_v4, %s6812_s11 }
  0xb5   : > { %v1106_v63 = vpop.permute.xlu1 %1105 }
  0xb6   : > { %3134 = vrot.lane.b32.xlu0 %v6905_v3, %s6812_s11  ;;  %v1104_v5 = vpop.permute.xlu0 %1103  ;;  %v1120_v10 = vsel %vm256_vm1, %v1106_v63, 0 }
  0xb7   : > { %v1109_v7 = vsel %vm1107_vm10, %v1104_v5, %v1106_v63  ;;  %v1108_v11 = vsel %vm1107_vm10, %v1102_v59, %v1104_v5  ;;  %vm2498_vm10 = vcmask 556032  }
  0xb8   : > { %5673 = vmatmul.mubr.msk.bf16.vlgmr.msra.gmra.mrb[0].mxu0 %vm252_vm2, %v5671_v44  ;;  %3241 = vrot.lane.b32.xlu1 %v6905_v3, %s6813_s19  ;;  %v1114_v14 = vsel %vm256_vm1, %v1108_v11, 0 }
  0xb9   : > { %802 = vmatpush1.bf16.msra.mxu0 %v793_v49  ;;  %833 = vmatprep.mubr.bf16.mxu0 %v6785_v1  ;;  %v1211_v12 = vpop.permute.xlu1 %1210  ;;  %v5703_v49 = vld [vmem:[%s6920_s30 + $0x30] sm:$0xf] }
  0xba   : > { %5680 = vmatprep.subr.msk.bf16.mxu0 %vm256_vm1, %v895_v50  ;;  %3138 = vrot.lane.b32.xlu0 %v6902_v2, %s6812_s11  ;;  %v1209_v8 = vpop.permute.xlu0 %1208  ;;  %s6831_s11 = smov 4  }
  0xbb   : > { %v1215_v19 = vsel %vm1214_vm11, %v1209_v8, %v1211_v12 }
  0xbc   : > { %3245 = vrot.lane.b32.xlu1 %v6902_v2, %s6813_s19  ;;  %v1221_v22 = vsel %vm256_vm1, %v1215_v19, 0 }
  0xbd   : > { %v1316_v16 = vpop.permute.xlu1 %1315 }
  0xbe   : > { %5988 = vmatmul.mubr.msk.bf16.vlgmr.msra.gmra.mrb[0].mxu1 %vm252_vm2, %v5675_v52  ;;  %3243 = vrot.lane.b32.xlu0 %v6908_v4, %s6813_s19  ;;  %v1213_v13 = vpop.permute.xlu0 %1212  ;;  %s6832_s19 = smov 3  }
  0xbf   : > { %5992 = vmatpush3.bf16.msra.mxu1 %v906_v53  ;;  %5993 = vmatprep.mubr.msk.bf16.mxu1 %vm6784_vm0, %v6783_v0  ;;  %v1216_v15 = vsel %vm1214_vm11, %v1211_v12, %v1213_v13  ;;  %v1227_v18 = vsel %vm256_vm1, %v1213_v13, 0  ;;  %vm2605_vm11 = vcmask 547840  }
  0xc0   : > { %5997 = vmatprep.subr.bf16.mxu1 %v6783_v0  ;;  %3350 = vrot.lane.b32.xlu1 %v6908_v4, %s6814_s20 }
  0xc1   : > { %v1320_v20 = vpop.permute.xlu1 %1319 }
  0xc2   : > { %3348 = vrot.lane.b32.xlu0 %v6905_v3, %s6814_s20  ;;  %v1318_v21 = vpop.permute.xlu0 %1317  ;;  %v1334_v26 = vsel %vm256_vm1, %v1320_v20, 0 }
  0xc3   : > { %v1323_v23 = vsel %vm1321_vm12, %v1318_v21, %v1320_v20  ;;  %v1322_v27 = vsel %vm1321_vm12, %v1316_v16, %v1318_v21  ;;  %vm2712_vm12 = vcmask 539648  }
  0xc4   : > { %5677 = vmatmul.mubr.msk.bf16.vlgmr.msra.gmra.mrb[0].mxu0 %vm252_vm2, %v5675_v52  ;;  %3455 = vrot.lane.b32.xlu1 %v6905_v3, %s6815_s21  ;;  %v1328_v30 = vsel %vm256_vm1, %v1322_v27, 0 }
  0xc5   : > { %909 = vmatpush1.bf16.msra.mxu0 %v900_v57  ;;  %940 = vmatprep.mubr.bf16.mxu0 %v6785_v1  ;;  %v1425_v28 = vpop.permute.xlu1 %1424  ;;  %v5707_v57 = vld [vmem:[%s6920_s30 + $0x34] sm:$0xf] }
  0xc6   : > { %5684 = vmatprep.subr.msk.bf16.mxu0 %vm256_vm1, %v1002_v58  ;;  %3352 = vrot.lane.b32.xlu0 %v6902_v2, %s6814_s20  ;;  %v1423_v24 = vpop.permute.xlu0 %1422  ;;  %s6833_s20 = smov 2  }
  0xc7   : > { %v1429_v35 = vsel %vm1428_vm13, %v1423_v24, %v1425_v28 }
  0xc8   : > { %3459 = vrot.lane.b32.xlu1 %v6902_v2, %s6815_s21  ;;  %v1435_v38 = vsel %vm256_vm1, %v1429_v35, 0 }
  0xc9   : > { %v1530_v32 = vpop.permute.xlu1 %1529 }
  0xca   : > { %5994 = vmatmul.mubr.msk.bf16.vlgmr.msra.gmra.mrb[0].mxu1 %vm252_vm2, %v5679_v60  ;;  %3457 = vrot.lane.b32.xlu0 %v6908_v4, %s6815_s21  ;;  %v1427_v29 = vpop.permute.xlu0 %1426 }
  0xcb   : > { %5998 = vmatpush3.bf16.msra.mxu1 %v1013_v61  ;;  %5999 = vmatprep.mubr.msk.bf16.mxu1 %vm6784_vm0, %v6783_v0  ;;  %v1430_v31 = vsel %vm1428_vm13, %v1425_v28, %v1427_v29  ;;  %v1441_v34 = vsel %vm256_vm1, %v1427_v29, 0  ;;  %vm2819_vm13 = vcmask 531456  }
  0xcc   : > { %6003 = vmatprep.subr.bf16.mxu1 %v6783_v0  ;;  %3564 = vrot.lane.b32.xlu1 %v6908_v4, %s6816_s22 }
  0xcd   : > { %v1534_v36 = vpop.permute.xlu1 %1533 }
  0xce   : > { %3562 = vrot.lane.b32.xlu0 %v6905_v3, %s6816_s22  ;;  %v1532_v37 = vpop.permute.xlu0 %1531  ;;  %v1548_v42 = vsel %vm256_vm1, %v1534_v36, 0 }
  0xcf   : > { %v1537_v39 = vsel %vm1535_vm14, %v1532_v37, %v1534_v36  ;;  %v1536_v43 = vsel %vm1535_vm14, %v1530_v32, %v1532_v37  ;;  %vm2926_vm14 = vcmask 523264  }
  0xd0   : > { %5681 = vmatmul.mubr.msk.bf16.vlgmr.msra.gmra.mrb[0].mxu0 %vm252_vm2, %v5679_v60  ;;  %3669 = vrot.lane.b32.xlu1 %v6905_v3, %s6817_s23  ;;  %v1542_v46 = vsel %vm256_vm1, %v1536_v43, 0 }
  0xd1   : > { %1016 = vmatpush1.bf16.msra.mxu0 %v1007_v6  ;;  %1047 = vmatprep.mubr.bf16.mxu0 %v6785_v1  ;;  %v1639_v44 = vpop.permute.xlu1 %1638  ;;  %v5711_v6 = vld [vmem:[%s6920_s30 + $0x38] sm:$0xf] }
  0xd2   : > { %5688 = vmatprep.subr.msk.bf16.mxu0 %vm256_vm1, %v1109_v7  ;;  %3566 = vrot.lane.b32.xlu0 %v6902_v2, %s6816_s22  ;;  %v1637_v40 = vpop.permute.xlu0 %1636 }
  0xd3   : > { %v1643_v51 = vsel %vm1642_vm15, %v1637_v40, %v1639_v44 }
  0xd4   : > { %3673 = vrot.lane.b32.xlu1 %v6902_v2, %s6817_s23  ;;  %v1649_v54 = vsel %vm256_vm1, %v1643_v51, 0  ;;  %v7283_v51 = vld [vmem:[%s6899_s25 + $0xc] ss:$16 sps:$4 sm:$0x3f]  }
  0xd5   : > { %v1744_v48 = vpop.permute.xlu1 %1743 }
  0xd6   : > { %6000 = vmatmul.mubr.msk.bf16.vlgmr.msra.gmra.mrb[0].mxu1 %vm252_vm2, %v5683_v9  ;;  %3671 = vrot.lane.b32.xlu0 %v6908_v4, %s6817_s23  ;;  %v1641_v45 = vpop.permute.xlu0 %1640  ;;  %s6638_s23 = smul.u32 3, %s7689_s12 }
  0xd7   : > { %6004 = vmatpush3.bf16.msra.mxu1 %v1120_v10  ;;  %6005 = vmatprep.mubr.msk.bf16.mxu1 %vm6784_vm0, %v6783_v0  ;;  %v1644_v47 = vsel %vm1642_vm15, %v1639_v44, %v1641_v45  ;;  %v1655_v50 = vsel %vm256_vm1, %v1641_v45, 0  ;;  %v5731_v44 = vld [vmem:[%s6920_s30 + $0x4c] sm:$0xf]  ;;  %vm3033_vm15 = vcmask 515072  }
  0xd8   : > { %6009 = vmatprep.subr.bf16.mxu1 %v6783_v0  ;;  %3778 = vrot.lane.b32.xlu1 %v6908_v4, %s6818_s24 }
  0xd9   : > { %v1748_v52 = vpop.permute.xlu1 %1747 }
  0xda   : > { %3776 = vrot.lane.b32.xlu0 %v6905_v3, %s6818_s24  ;;  %v1746_v53 = vpop.permute.xlu0 %1745  ;;  %v1762_v58 = vsel %vm256_vm1, %v1748_v52, 0 }
  0xdb   : > { %v1751_v55 = vsel %vm1749_vm3, %v1746_v53, %v1748_v52  ;;  %v1750_v59 = vsel %vm1749_vm3, %v1744_v48, %v1746_v53  ;;  %vm3140_vm3 = vcmask 506880  }
  0xdc   : > { %5685 = vmatmul.mubr.msk.bf16.vlgmr.msra.gmra.mrb[0].mxu0 %vm252_vm2, %v5683_v9  ;;  %3883 = vrot.lane.b32.xlu1 %v6905_v3, %s6819_s26  ;;  %v1756_v62 = vsel %vm256_vm1, %v1750_v59, 0 }
  0xdd   : > { %1123 = vmatpush1.bf16.msra.mxu0 %v1114_v14  ;;  %1154 = vmatprep.mubr.bf16.mxu0 %v6785_v1  ;;  %v1853_v60 = vpop.permute.xlu1 %1852  ;;  %v5715_v14 = vld [vmem:[%s6920_s30 + $0x3c] sm:$0xf] }
  0xde   : > { %5692 = vmatprep.subr.msk.bf16.mxu0 %vm256_vm1, %v1216_v15  ;;  %3780 = vrot.lane.b32.xlu0 %v6902_v2, %s6818_s24  ;;  %v1851_v56 = vpop.permute.xlu0 %1850  ;;  %s6639_s24 = smul.u32 9, %s7687_s13 }
  0xdf   : > { %v1857_v8 = vsel %vm1856_vm4, %v1851_v56, %v1853_v60 }
  0xe0   : > { %3887 = vrot.lane.b32.xlu1 %v6902_v2, %s6819_s26  ;;  %v1863_v11 = vsel %vm256_vm1, %v1857_v8, 0 }
  0xe1   : > { %v1958_v5 = vpop.permute.xlu1 %1957 }
  0xe2   : > { %6006 = vmatmul.mubr.msk.bf16.vlgmr.msra.gmra.mrb[0].mxu1 %vm252_vm2, %v5687_v17  ;;  %3885 = vrot.lane.b32.xlu0 %v6908_v4, %s6819_s26  ;;  %v1855_v61 = vpop.permute.xlu0 %1854  ;;  %s224_s26 = sadd.s32 %s6639_s24, %s6638_s23 }
  0xe3   : > { %6010 = vmatpush3.bf16.msra.mxu1 %v1227_v18  ;;  %6011 = vmatprep.mubr.msk.bf16.mxu1 %vm6784_vm0, %v6783_v0  ;;  %v1858_v63 = vsel %vm1856_vm4, %v1853_v60, %v1855_v61  ;;  %v1869_v7 = vsel %vm256_vm1, %v1855_v61, 0  ;;  %vm3247_vm4 = vcmask 392192  }
  0xe4   : > { %6015 = vmatprep.subr.bf16.mxu1 %v6783_v0  ;;  %3992 = vrot.lane.b32.xlu1 %v6908_v4, %s6820_s27 }
  0xe5   : > { %v1962_v9 = vpop.permute.xlu1 %1961 }
  0xe6   : > { %3990 = vrot.lane.b32.xlu0 %v6905_v3, %s6820_s27  ;;  %v1960_v10 = vpop.permute.xlu0 %1959  ;;  %v1976_v15 = vsel %vm256_vm1, %v1962_v9, 0 }
  0xe7   : > { %v1965_v12 = vsel %vm1963_vm5, %v1960_v10, %v1962_v9  ;;  %v1964_v16 = vsel %vm1963_vm5, %v1958_v5, %v1960_v10  ;;  %vm3354_vm5 = vcmask 384000  }
  0xe8   : > { %5689 = vmatmul.mubr.msk.bf16.vlgmr.msra.gmra.mrb[0].mxu0 %vm252_vm2, %v5687_v17  ;;  %4097 = vrot.lane.b32.xlu1 %v6905_v3, %s6821_s28  ;;  %v1970_v19 = vsel %vm256_vm1, %v1964_v16, 0 }
  0xe9   : > { %1230 = vmatpush1.bf16.msra.mxu0 %v1221_v22  ;;  %1261 = vmatprep.mubr.bf16.mxu0 %v6785_v1  ;;  %v2067_v17 = vpop.permute.xlu1 %2066  ;;  %v5719_v22 = vld [vmem:[%s6920_s30 + $0x40] sm:$0xf] }
  0xea   : > { %5696 = vmatprep.subr.msk.bf16.mxu0 %vm256_vm1, %v1323_v23  ;;  %3994 = vrot.lane.b32.xlu0 %v6902_v2, %s6820_s27  ;;  %v2065_v13 = vpop.permute.xlu0 %2064  ;;  %s5652_s27 = sshll.u32 %s224_s26, 3 }
  0xeb   : > { %v2071_v24 = vsel %vm2070_vm6, %v2065_v13, %v2067_v17 }
  0xec   : > { %4101 = vrot.lane.b32.xlu1 %v6902_v2, %s6821_s28  ;;  %v2077_v27 = vsel %vm256_vm1, %v2071_v24, 0 }
  0xed   : > { %v2172_v21 = vpop.permute.xlu1 %2171 }
  0xee   : > { %6012 = vmatmul.mubr.msk.bf16.vlgmr.msra.gmra.mrb[0].mxu1 %vm252_vm2, %v5691_v25  ;;  %4099 = vrot.lane.b32.xlu0 %v6908_v4, %s6821_s28  ;;  %v2069_v18 = vpop.permute.xlu0 %2068 }
  0xef   : > { %6016 = vmatpush3.bf16.msra.mxu1 %v1334_v26  ;;  %6017 = vmatprep.mubr.msk.bf16.mxu1 %vm6784_vm0, %v6783_v0  ;;  %v2072_v20 = vsel %vm2070_vm6, %v2067_v17, %v2069_v18  ;;  %v2083_v23 = vsel %vm256_vm1, %v2069_v18, 0  ;;  %vm3461_vm6 = vcmask 375808  }
  0xf0   : > { %6021 = vmatprep.subr.bf16.mxu1 %v6783_v0  ;;  %4206 = vrot.lane.b32.xlu1 %v6908_v4, %s6822_s29 }
  0xf2   : > { %4204 = vrot.lane.b32.xlu0 %v6905_v3, %s6822_s29  ;;  %v2174_v26 = vpop.permute.xlu0 %2173 }
  0xf3   : > { %v2178_v32 = vsel %vm2177_vm7, %v2172_v21, %v2174_v26 }
  0xf4   : > { %5693 = vmatmul.mubr.msk.bf16.vlgmr.msra.gmra.mrb[0].mxu0 %vm252_vm2, %v5691_v25  ;;  %v2176_v25 = vpop.permute.xlu1 %2175  ;;  %4311 = vrot.lane.b32.xlu1 %v6905_v3, %s6823_s4  ;;  %v2184_v35 = vsel %vm256_vm1, %v2178_v32, 0 }
  0xf5   : > { %1337 = vmatpush1.bf16.msra.mxu0 %v1328_v30  ;;  %1368 = vmatprep.mubr.bf16.mxu0 %v6785_v1  ;;  %v2179_v28 = vsel %vm2177_vm7, %v2174_v26, %v2176_v25  ;;  %v5723_v30 = vld [vmem:[%s6920_s30 + $0x44] sm:$0xf]  ;;  %vm3568_vm7 = vcmask 367616  }
  0xf6   : > { %5700 = vmatprep.subr.msk.bf16.mxu0 %vm256_vm1, %v1430_v31  ;;  %4208 = vrot.lane.b32.xlu0 %v6902_v2, %s6822_s29  ;;  %v2279_v29 = vpop.permute.xlu0 %2278  ;;  %v2190_v31 = vsel %vm256_vm1, %v2176_v25, 0 }
  0xf8   : > { %4315 = vrot.lane.b32.xlu1 %v6902_v2, %s6823_s4 }
  0xfa   : > { %6018 = vmatmul.mubr.msk.bf16.vlgmr.msra.gmra.mrb[0].mxu1 %vm252_vm2, %v5695_v33  ;;  %4313 = vrot.lane.b32.xlu0 %v6908_v4, %s6823_s4  ;;  %s226_s4 = scalar_lea.vmem %s7675_s3, %s5652_s27 }
  0xfb   : > { %6022 = vmatpush3.bf16.msra.mxu1 %v1441_v34  ;;  %6023 = vmatprep.mubr.msk.bf16.mxu1 %vm6784_vm0, %v6783_v0  ;;  %v2283_v34 = vpop.permute.xlu0 %2282 }
  0xfc   : > { %6027 = vmatprep.subr.bf16.mxu1 %v6783_v0  ;;  %4420 = vrot.lane.b32.xlu1 %v6908_v4, %s6824_s5 }
  0xfe   : > { %4418 = vrot.lane.b32.xlu0 %v6905_v3, %s6824_s5 }
 0x100   : > { %5697 = vmatmul.mubr.msk.bf16.vlgmr.msra.gmra.mrb[0].mxu0 %vm252_vm2, %v5695_v33  ;;  %v2281_v33 = vpop.permute.xlu1 %2280 }
 0x101   : > { %1444 = vmatpush1.bf16.msra.mxu0 %v1435_v38  ;;  %1475 = vmatprep.mubr.bf16.mxu0 %v6785_v1  ;;  %v2286_v36 = vsel %vm2284_vm8, %v2281_v33, %v2283_v34  ;;  %v5727_v38 = vld [vmem:[%s6920_s30 + $0x48] sm:$0xf]  ;;  %v2285_v40 = vsel %vm2284_vm8, %v2279_v29, %v2281_v33  ;;  %vm3675_vm8 = vcmask 359424  }
 0x102   : > { %5704 = vmatprep.subr.msk.bf16.mxu0 %vm256_vm1, %v1537_v39  ;;  %v2297_v39 = vsel %vm256_vm1, %v2283_v34, 0  ;;  %4422 = vrot.lane.b32.xlu0 %v6902_v2, %s6824_s5  ;;  %v2291_v3 = vsel %vm256_vm1, %v2285_v40, 0  ;;  %v7275_v2 = vld [vmem:[%s6899_s25 + $0x8] ss:$16 sps:$4 sm:$0x3f]  }
 0x104   : > { %v2386_v37 = vpop.permute.xlu1 %2385 }
 0x106   : > { %6024 = vmatmul.mubr.msk.bf16.vlgmr.msra.gmra.mrb[0].mxu1 %vm252_vm2, %v5699_v41 }
 0x107   : > { %6028 = vmatpush3.bf16.msra.mxu1 %v1548_v42  ;;  %6029 = vmatprep.mubr.msk.bf16.mxu1 %vm6784_vm0, %v6783_v0  ;;  %v2388_v42 = vpop.permute.xlu0 %2387 }
 0x108   : > { %6033 = vmatprep.subr.bf16.mxu1 %v6783_v0  ;;  %v2392_v48 = vsel %vm2391_vm9, %v2386_v37, %v2388_v42 }
 0x109   : > { %v2398_v52 = vsel %vm256_vm1, %v2392_v48, 0 }
 0x10b   : > { %v2493_v43 = vpop.permute.xlu0 %2492 }
 0x10c   : > { %5701 = vmatmul.mubr.msk.bf16.vlgmr.msra.gmra.mrb[0].mxu0 %vm252_vm2, %v5699_v41  ;;  %v2390_v41 = vpop.permute.xlu1 %2389 }
 0x10d   : > { %1551 = vmatpush1.bf16.msra.mxu0 %v1542_v46  ;;  %1582 = vmatprep.mubr.bf16.mxu0 %v6785_v1  ;;  %v2393_v4 = vsel %vm2391_vm9, %v2388_v42, %v2390_v41  ;;  %v2404_v45 = vsel %vm256_vm1, %v2390_v41, 0  ;;  %v7267_v46 = vld [vmem:[%s6899_s25] ss:$16 sps:$4 sm:$0x3f]   ;;  %vm3782_vm9 = vcmask 351232  }
 0x10e   : > { %5708 = vmatprep.subr.msk.bf16.mxu0 %vm256_vm1, %v1644_v47  ;;  %v7270_v47 = vld [vmem:[%s6899_s25 + $0x4] ss:$16 sps:$4 sm:$0x3f]   ;;  %4545 = vrot.lane.b32.xlu1 %v7267_v46, %s6825_s6  ;;  %s6826_s25 = smov 22  }
 0x10f   : > { %4547 = vrot.lane.b32.xlu0 %v7270_v47, %s6825_s6 }
 0x112   : > { %6030 = vmatmul.mubr.msk.bf16.vlgmr.msra.gmra.mrb[0].mxu1 %vm252_vm2, %v5703_v49  ;;  %4549 = vrot.lane.b32.xlu1 %v7275_v2, %s6825_s6 }
 0x113   : > { %6034 = vmatpush3.bf16.msra.mxu1 %v1655_v50  ;;  %6035 = vmatprep.mubr.msk.bf16.mxu1 %vm6784_vm0, %v6783_v0  ;;  %v2497_v50 = vpop.permute.xlu0 %2496 }
 0x114   : > { %6039 = vmatprep.subr.bf16.mxu1 %v6783_v0  ;;  %4551 = vrot.lane.b32.xlu0 %v7283_v51, %s6825_s6  ;;  %v2511_v56 = vsel %vm256_vm1, %v2497_v50, 0 }
 0x116   : > { %4655 = vrot.lane.b32.xlu1 %v7267_v46, %s6826_s25 }
 0x117   : > { %v2602_v59 = vpop.permute.xlu0 %2601 }
 0x118   : > { %5705 = vmatmul.mubr.msk.bf16.vlgmr.msra.gmra.mrb[0].mxu0 %vm252_vm2, %v5703_v49  ;;  %v2495_v49 = vpop.permute.xlu1 %2494  ;;  %4657 = vrot.lane.b32.xlu0 %v7270_v47, %s6826_s25 }
 0x119   : > { %1658 = vmatpush1.bf16.msra.mxu0 %v1649_v54  ;;  %1689 = vmatprep.mubr.bf16.mxu0 %v6785_v1  ;;  %v2500_v53 = vsel %vm2498_vm10, %v2495_v49, %v2497_v50 }
 0x11a   : > { %5712 = vmatprep.subr.msk.bf16.mxu0 %vm256_vm1, %v1751_v55  ;;  %v5735_v55 = vld [vmem:[%s6920_s30 + $0x50] sm:$0xf]  ;;  %4659 = vrot.lane.b32.xlu1 %v7275_v2, %s6826_s25 }
 0x11c   : > { %v2600_v54 = vpop.permute.xlu1 %2599  ;;  %4661 = vrot.lane.b32.xlu0 %v7283_v51, %s6826_s25 }
 0x11e   : > { %6036 = vmatmul.mubr.msk.bf16.vlgmr.msra.gmra.mrb[0].mxu1 %vm252_vm2, %v5707_v57  ;;  %4765 = vrot.lane.b32.xlu1 %v7267_v46, %s6827_s7 }
 0x11f   : > { %6040 = vmatpush3.bf16.msra.mxu1 %v1762_v58  ;;  %6041 = vmatprep.mubr.msk.bf16.mxu1 %vm6784_vm0, %v6783_v0 }
 0x120   : > { %6045 = vmatprep.subr.bf16.mxu1 %v6783_v0  ;;  %v2604_v58 = vpop.permute.xlu1 %2603  ;;  %4767 = vrot.lane.b32.xlu0 %v7270_v47, %s6827_s7 }
 0x121   : > { %v2607_v61 = vsel %vm2605_vm11, %v2602_v59, %v2604_v58  ;;  %v2618_v5 = vsel %vm256_vm1, %v2604_v58, 0 }
 0x122   : > { %4769 = vrot.lane.b32.xlu1 %v7275_v2, %s6827_s7 }
 0x124   : > { %5709 = vmatmul.mubr.msk.bf16.vlgmr.msra.gmra.mrb[0].mxu0 %vm252_vm2, %v5707_v57  ;;  %v2499_v57 = vsel %vm2498_vm10, %v2493_v43, %v2495_v49  ;;  %4771 = vrot.lane.b32.xlu0 %v7283_v51, %s6827_s7  ;;  %vm3889_vm10 = vcmask 343040  }
 0x125   : > { %1765 = vmatpush1.bf16.msra.mxu0 %v1756_v62  ;;  %1796 = vmatprep.mubr.bf16.mxu0 %v6785_v1  ;;  %v2505_v60 = vsel %vm256_vm1, %v2499_v57, 0  ;;  %v2707_v62 = vpop.permute.xlu0 %2706 }
 0x126   : > { %5716 = vmatprep.subr.msk.bf16.mxu0 %vm256_vm1, %v1858_v63  ;;  %v5739_v63 = vld [vmem:[%s6920_s30 + $0x54] sm:$0xf]  ;;  %4875 = vrot.lane.b32.xlu1 %v7267_v46, %s6828_s8 }
 0x128   : > { %4877 = vrot.lane.b32.xlu0 %v7270_v47, %s6828_s8 }
 0x129   : > { %v2711_v8 = vpop.permute.xlu0 %2710 }
 0x12a   : > { %6042 = vmatmul.mubr.msk.bf16.vlgmr.msra.gmra.mrb[0].mxu1 %vm252_vm2, %v5711_v6  ;;  %v2725_v13 = vsel %vm256_vm1, %v2711_v8, 0  ;;  %4879 = vrot.lane.b32.xlu1 %v7275_v2, %s6828_s8 }
 0x12b   : > { %6046 = vmatpush3.bf16.msra.mxu1 %v1869_v7  ;;  %6047 = vmatprep.mubr.msk.bf16.mxu1 %vm6784_vm0, %v6783_v0  ;;  %v2709_v7 = vpop.permute.xlu1 %2708 }
 0x12c   : > { %6051 = vmatprep.subr.bf16.mxu1 %v6783_v0  ;;  %v2714_v10 = vsel %vm2712_vm12, %v2709_v7, %v2711_v8  ;;  %4881 = vrot.lane.b32.xlu0 %v7283_v51, %s6828_s8 }
 0x12d   : > { %v2816_v16 = vpop.permute.xlu0 %2815 }
 0x12e   : > { %4985 = vrot.lane.b32.xlu1 %v7267_v46, %s6829_s9 }
 0x130   : > { %5713 = vmatmul.mubr.msk.bf16.vlgmr.msra.gmra.mrb[0].mxu0 %vm252_vm2, %v5711_v6  ;;  %v2606_v6 = vsel %vm2605_vm11, %v2600_v54, %v2602_v59  ;;  %4987 = vrot.lane.b32.xlu0 %v7270_v47, %s6829_s9  ;;  %v5767_v59 = vld [vmem:[%s6920_s30 + $0x70] sm:$0xf]  ;;  %vm3996_vm11 = vcmask 228352  }
 0x131   : > { %1872 = vmatpush1.bf16.msra.mxu0 %v1863_v11  ;;  %1903 = vmatprep.mubr.bf16.mxu0 %v6785_v1  ;;  %v2612_v9 = vsel %vm256_vm1, %v2606_v6, 0  ;;  %v2814_v11 = vpop.permute.xlu1 %2813  ;;  %v5771_v6 = vld [vmem:[%s6920_s30 + $0x74] sm:$0xf] }
 0x132   : > { %5720 = vmatprep.subr.msk.bf16.mxu0 %vm256_vm1, %v1965_v12  ;;  %v5743_v12 = vld [vmem:[%s6920_s30 + $0x58] sm:$0xf]  ;;  %4989 = vrot.lane.b32.xlu1 %v7275_v2, %s6829_s9 }
 0x134   : > { %4991 = vrot.lane.b32.xlu0 %v7283_v51, %s6829_s9 }
 0x136   : > { %6048 = vmatmul.mubr.msk.bf16.vlgmr.msra.gmra.mrb[0].mxu1 %vm252_vm2, %v5715_v14  ;;  %5095 = vrot.lane.b32.xlu1 %v7267_v46, %s6830_s10 }
 0x137   : > { %6052 = vmatpush3.bf16.msra.mxu1 %v1976_v15  ;;  %6053 = vmatprep.mubr.msk.bf16.mxu1 %vm6784_vm0, %v6783_v0  ;;  %v2818_v15 = vpop.permute.xlu1 %2817 }
 0x138   : > { %6057 = vmatprep.subr.bf16.mxu1 %v6783_v0  ;;  %v2821_v18 = vsel %vm2819_vm13, %v2816_v16, %v2818_v15  ;;  %v2832_v21 = vsel %vm256_vm1, %v2818_v15, 0  ;;  %5097 = vrot.lane.b32.xlu0 %v7270_v47, %s6830_s10 }
 0x13a   : > { %5099 = vrot.lane.b32.xlu1 %v7275_v2, %s6830_s10 }
 0x13c   : > { %5717 = vmatmul.mubr.msk.bf16.vlgmr.msra.gmra.mrb[0].mxu0 %vm252_vm2, %v5715_v14  ;;  %v2713_v14 = vsel %vm2712_vm12, %v2707_v62, %v2709_v7  ;;  %5101 = vrot.lane.b32.xlu0 %v7283_v51, %s6830_s10  ;;  %vm4103_vm12 = vcmask 220160  }
 0x13d   : > { %1979 = vmatpush1.bf16.msra.mxu0 %v1970_v19  ;;  %2010 = vmatprep.mubr.bf16.mxu0 %v6785_v1  ;;  %v2719_v17 = vsel %vm256_vm1, %v2713_v14, 0  ;;  %v2921_v19 = vpop.permute.xlu0 %2920  ;;  %v5775_v14 = vld [vmem:[%s6920_s30 + $0x78] sm:$0xf] }
 0x13e   : > { %5724 = vmatprep.subr.msk.bf16.mxu0 %vm256_vm1, %v2072_v20  ;;  %v5747_v20 = vld [vmem:[%s6920_s30 + $0x5c] sm:$0xf]  ;;  %5205 = vrot.lane.b32.xlu1 %v7267_v46, %s6831_s11 }
 0x140   : > { %5207 = vrot.lane.b32.xlu0 %v7270_v47, %s6831_s11 }
 0x141   : > { %v2925_v24 = vpop.permute.xlu0 %2924 }
 0x142   : > { %6054 = vmatmul.mubr.msk.bf16.vlgmr.msra.gmra.mrb[0].mxu1 %vm252_vm2, %v5719_v22  ;;  %v2939_v29 = vsel %vm256_vm1, %v2925_v24, 0  ;;  %5209 = vrot.lane.b32.xlu1 %v7275_v2, %s6831_s11 }
 0x143   : > { %6058 = vmatpush3.bf16.msra.mxu1 %v2083_v23  ;;  %6059 = vmatprep.mubr.msk.bf16.mxu1 %vm6784_vm0, %v6783_v0  ;;  %v2923_v23 = vpop.permute.xlu1 %2922 }
 0x144   : > { %6063 = vmatprep.subr.bf16.mxu1 %v6783_v0  ;;  %v2928_v26 = vsel %vm2926_vm14, %v2923_v23, %v2925_v24  ;;  %5211 = vrot.lane.b32.xlu0 %v7283_v51, %s6831_s11 }
 0x145   : > { %v3030_v32 = vpop.permute.xlu0 %3029 }
 0x146   : > { %5315 = vrot.lane.b32.xlu1 %v7267_v46, %s6832_s19 }
 0x148   : > { %5721 = vmatmul.mubr.msk.bf16.vlgmr.msra.gmra.mrb[0].mxu0 %vm252_vm2, %v5719_v22  ;;  %v2820_v22 = vsel %vm2819_vm13, %v2814_v11, %v2816_v16  ;;  %5317 = vrot.lane.b32.xlu0 %v7270_v47, %s6832_s19  ;;  %vm4210_vm13 = vcmask 211968  }
 0x149   : > { %2086 = vmatpush1.bf16.msra.mxu0 %v2077_v27  ;;  %2117 = vmatprep.mubr.bf16.mxu0 %v6785_v1  ;;  %v2826_v25 = vsel %vm256_vm1, %v2820_v22, 0  ;;  %v3028_v27 = vpop.permute.xlu1 %3027  ;;  %v5779_v22 = vld [vmem:[%s6920_s30 + $0x7c] sm:$0xf] }
 0x14a   : > { %5728 = vmatprep.subr.msk.bf16.mxu0 %vm256_vm1, %v2179_v28  ;;  %v5751_v28 = vld [vmem:[%s6920_s30 + $0x60] sm:$0xf]  ;;  %5319 = vrot.lane.b32.xlu1 %v7275_v2, %s6832_s19 }
 0x14c   : > { %5321 = vrot.lane.b32.xlu0 %v7283_v51, %s6832_s19 }
 0x14e   : > { %6060 = vmatmul.mubr.msk.bf16.vlgmr.msra.gmra.mrb[0].mxu1 %vm252_vm2, %v5723_v30  ;;  %5425 = vrot.lane.b32.xlu1 %v7267_v46, %s6833_s20 }
 0x14f   : > { %6064 = vmatpush3.bf16.msra.mxu1 %v2190_v31  ;;  %6065 = vmatprep.mubr.msk.bf16.mxu1 %vm6784_vm0, %v6783_v0  ;;  %v3032_v31 = vpop.permute.xlu1 %3031 }
 0x150   : > { %6069 = vmatprep.subr.bf16.mxu1 %v6783_v0  ;;  %v3035_v34 = vsel %vm3033_vm15, %v3030_v32, %v3032_v31  ;;  %v3046_v37 = vsel %vm256_vm1, %v3032_v31, 0  ;;  %5427 = vrot.lane.b32.xlu0 %v7270_v47, %s6833_s20 }
 0x152   : > { %5429 = vrot.lane.b32.xlu1 %v7275_v2, %s6833_s20 }
 0x154   : > { %5725 = vmatmul.mubr.msk.bf16.vlgmr.msra.gmra.mrb[0].mxu0 %vm252_vm2, %v5723_v30  ;;  %v2927_v30 = vsel %vm2926_vm14, %v2921_v19, %v2923_v23  ;;  %5431 = vrot.lane.b32.xlu0 %v7283_v51, %s6833_s20  ;;  %vm4317_vm14 = vcmask 203776  }
 0x155   : > { %2193 = vmatpush1.bf16.msra.mxu0 %v2184_v35  ;;  %2224 = vmatprep.mubr.bf16.mxu0 %v6785_v1  ;;  %v2933_v33 = vsel %vm256_vm1, %v2927_v30, 0  ;;  %v3135_v35 = vpop.permute.xlu0 %3134  ;;  %v5783_v30 = vld [vmem:[%s6920_s30 + $0x80] sm:$0xf] }
 0x156   : > { %5732 = vmatprep.subr.msk.bf16.mxu0 %vm256_vm1, %v2286_v36  ;;  %v5755_v36 = vld [vmem:[%s6920_s30 + $0x64] sm:$0xf] }
 0x159   : > { %v3139_v40 = vpop.permute.xlu0 %3138 }
 0x15a   : > { %6066 = vmatmul.mubr.msk.bf16.vlgmr.msra.gmra.mrb[0].mxu1 %vm252_vm2, %v5727_v38  ;;  %v3153_v43 = vsel %vm256_vm1, %v3139_v40, 0 }
 0x15b   : > { %6070 = vmatpush3.bf16.msra.mxu1 %v2297_v39  ;;  %6071 = vmatprep.mubr.msk.bf16.mxu1 %vm6784_vm0, %v6783_v0  ;;  %v3137_v39 = vpop.permute.xlu1 %3136 }
 0x15c   : > { %6075 = vmatprep.subr.bf16.mxu1 %v6783_v0  ;;  %v3142_v42 = vsel %vm3140_vm3, %v3137_v39, %v3139_v40 }
 0x15d   : > { %v3244_v48 = vpop.permute.xlu0 %3243 }
 0x160   : > { %5729 = vmatmul.mubr.msk.bf16.vlgmr.msra.gmra.mrb[0].mxu0 %vm252_vm2, %v5727_v38  ;;  %v3034_v38 = vsel %vm3033_vm15, %v3028_v27, %v3030_v32  ;;  %vm4424_vm15 = vcmask 195584  }
 0x161   : > { %2300 = vmatpush1.bf16.msra.mxu0 %v2291_v3  ;;  %2331 = vmatprep.mubr.bf16.mxu0 %v6785_v1  ;;  %v3040_v41 = vsel %vm256_vm1, %v3034_v38, 0  ;;  %v3242_v3 = vpop.permute.xlu1 %3241  ;;  %v5787_v38 = vld [vmem:[%s6920_s30 + $0x84] sm:$0xf] }
 0x162   : > { %5736 = vmatprep.subr.msk.bf16.mxu0 %vm256_vm1, %v2393_v4  ;;  %v5759_v4 = vld [vmem:[%s6920_s30 + $0x68] sm:$0xf] }
 0x166   : > { %6072 = vmatmul.mubr.msk.bf16.vlgmr.msra.gmra.mrb[0].mxu1 %vm252_vm2, %v5731_v44 }
 0x167   : > { %6076 = vmatpush3.bf16.msra.mxu1 %v2404_v45  ;;  %6077 = vmatprep.mubr.msk.bf16.mxu1 %vm6784_vm0, %v6783_v0  ;;  %v3246_v45 = vpop.permute.xlu1 %3245 }
 0x168   : > { %6081 = vmatprep.subr.bf16.mxu1 %v6783_v0  ;;  %v3249_v50 = vsel %vm3247_vm4, %v3244_v48, %v3246_v45  ;;  %v3260_v54 = vsel %vm256_vm1, %v3246_v45, 0 }
 0x16c   : > { %5733 = vmatmul.mubr.msk.bf16.vlgmr.msra.gmra.mrb[0].mxu0 %vm252_vm2, %v5731_v44  ;;  %v3141_v44 = vsel %vm3140_vm3, %v3135_v35, %v3137_v39  ;;  %vm4553_vm3 = vcmask 187392  }
 0x16d   : > { %2407 = vmatpush1.bf16.msra.mxu0 %v2398_v52  ;;  %2438 = vmatprep.mubr.bf16.mxu0 %v6785_v1  ;;  %v3147_v49 = vsel %vm256_vm1, %v3141_v44, 0  ;;  %v3349_v52 = vpop.permute.xlu0 %3348  ;;  %v5791_v44 = vld [vmem:[%s6920_s30 + $0x88] sm:$0xf] }
 0x16e   : > { %5740 = vmatprep.subr.msk.bf16.mxu0 %vm256_vm1, %v2500_v53  ;;  %v5763_v53 = vld [vmem:[%s6920_s30 + $0x6c] sm:$0xf] }
 0x171   : > { %v3353_v57 = vpop.permute.xlu0 %3352 }
 0x172   : > { %6078 = vmatmul.mubr.msk.bf16.vlgmr.msra.gmra.mrb[0].mxu1 %vm252_vm2, %v5735_v55 }
 0x173   : > { %6082 = vmatpush3.bf16.msra.mxu1 %v2511_v56  ;;  %6083 = vmatprep.mubr.msk.bf16.mxu1 %vm6784_vm0, %v6783_v0  ;;  %v3351_v56 = vpop.permute.xlu1 %3350 }
 0x174   : > { %6087 = vmatprep.subr.bf16.mxu1 %v6783_v0  ;;  %v3356_v47 = vsel %vm3354_vm5, %v3351_v56, %v3353_v57  ;;  %v3355_v2 = vsel %vm3354_vm5, %v3349_v52, %v3351_v56  ;;  %vm4773_vm5 = vcmask 64512  }
 0x175   : > { %v3361_v62 = vsel %vm256_vm1, %v3355_v2, 0  ;;  %v5799_v2 = vld [vmem:[%s6920_s30 + $0x90] sm:$0xf] }
 0x177   : > { %v3456_v58 = vpop.permute.xlu1 %3455 }
 0x178   : > { %5737 = vmatmul.mubr.msk.bf16.vlgmr.msra.gmra.mrb[0].mxu0 %vm252_vm2, %v5735_v55  ;;  %v3248_v55 = vsel %vm3247_vm4, %v3242_v3, %v3244_v48  ;;  %vm4663_vm4 = vcmask 179200  }
 0x179   : > { %2514 = vmatpush1.bf16.msra.mxu0 %v2505_v60  ;;  %2545 = vmatprep.mubr.bf16.mxu0 %v6785_v1  ;;  %v3254_v46 = vsel %vm256_vm1, %v3248_v55, 0  ;;  %v3367_v60 = vsel %vm256_vm1, %v3353_v57, 0  ;;  %v5795_v55 = vld [vmem:[%s6920_s30 + $0x8c] sm:$0xf] }
 0x17a   : > { %5744 = vmatprep.subr.msk.bf16.mxu0 %vm256_vm1, %v2607_v61  ;;  %v3458_v61 = vpop.permute.xlu0 %3457 }
 0x17b   : > { %v3460_v51 = vpop.permute.xlu1 %3459  ;;  %v3462_v8 = vsel %vm3461_vm6, %v3456_v58, %v3458_v61 }
 0x17c   : > { %v3474_v7 = vsel %vm256_vm1, %v3460_v51, 0  ;;  %v3468_v11 = vsel %vm256_vm1, %v3462_v8, 0  ;;  %v5803_v8 = vld [vmem:[%s6920_s30 + $0x94] sm:$0xf] }
 0x17e   : > { %6084 = vmatmul.mubr.msk.bf16.vlgmr.msra.gmra.mrb[0].mxu1 %vm252_vm2, %v5739_v63 }
 0x17f   : > { %6088 = vmatpush3.bf16.msra.mxu1 %v2618_v5  ;;  %6089 = vmatprep.mubr.msk.bf16.mxu1 %vm6784_vm0, %v6783_v0  ;;  %v3563_v5 = vpop.permute.xlu0 %3562 }
 0x180   : > { %6093 = vmatprep.subr.bf16.mxu1 %v6783_v0 }
 0x184   : > { %5741 = vmatmul.mubr.msk.bf16.vlgmr.msra.gmra.mrb[0].mxu0 %vm252_vm2, %v5739_v63  ;;  %v3463_v63 = vsel %vm3461_vm6, %v3458_v61, %v3460_v51  ;;  %vm4883_vm6 = vcmask 56320  }
 0x185   : > { %2621 = vmatpush1.bf16.msra.mxu0 %v2612_v9  ;;  %2652 = vmatprep.mubr.bf16.mxu0 %v6785_v1  ;;  %v3565_v9 = vpop.permute.xlu1 %3564 }
 0x186   : > { %5748 = vmatprep.subr.msk.bf16.mxu0 %vm256_vm1, %v2714_v10  ;;  %v3567_v10 = vpop.permute.xlu0 %3566  ;;  %v3569_v16 = vsel %vm3568_vm7, %v3563_v5, %v3565_v9 }
 0x187   : > { %v3581_v15 = vsel %vm256_vm1, %v3567_v10, 0  ;;  %v3575_v19 = vsel %vm256_vm1, %v3569_v16, 0  ;;  %v5807_v16 = vld [vmem:[%s6920_s30 + $0x98] sm:$0xf] }
 0x18a   : > { %6090 = vmatmul.mubr.msk.bf16.vlgmr.msra.gmra.mrb[0].mxu1 %vm252_vm2, %v5743_v12 }
 0x18b   : > { %6094 = vmatpush3.bf16.msra.mxu1 %v2725_v13  ;;  %6095 = vmatprep.mubr.msk.bf16.mxu1 %vm6784_vm0, %v6783_v0  ;;  %v3670_v13 = vpop.permute.xlu1 %3669 }
 0x18c   : > { %6099 = vmatprep.subr.bf16.mxu1 %v6783_v0 }
 0x190   : > { %5745 = vmatmul.mubr.msk.bf16.vlgmr.msra.gmra.mrb[0].mxu0 %vm252_vm2, %v5743_v12  ;;  %v3570_v12 = vsel %vm3568_vm7, %v3565_v9, %v3567_v10  ;;  %vm4993_vm7 = vcmask 48128  }
 0x191   : > { %2728 = vmatpush1.bf16.msra.mxu0 %v2719_v17  ;;  %2759 = vmatprep.mubr.bf16.mxu0 %v6785_v1  ;;  %v3674_v17 = vpop.permute.xlu1 %3673 }
 0x192   : > { %5752 = vmatprep.subr.msk.bf16.mxu0 %vm256_vm1, %v2821_v18  ;;  %v3672_v18 = vpop.permute.xlu0 %3671  ;;  %v3688_v23 = vsel %vm256_vm1, %v3674_v17, 0 }
 0x193   : > { %v3676_v24 = vsel %vm3675_vm8, %v3670_v13, %v3672_v18 }
 0x194   : > { %v3682_v27 = vsel %vm256_vm1, %v3676_v24, 0 }
 0x196   : > { %6096 = vmatmul.mubr.msk.bf16.vlgmr.msra.gmra.mrb[0].mxu1 %vm252_vm2, %v5747_v20 }
 0x197   : > { %6100 = vmatpush3.bf16.msra.mxu1 %v2832_v21  ;;  %6101 = vmatprep.mubr.msk.bf16.mxu1 %vm6784_vm0, %v6783_v0  ;;  %v3777_v21 = vpop.permute.xlu0 %3776 }
 0x198   : > { %6105 = vmatprep.subr.bf16.mxu1 %v6783_v0 }
 0x19c   : > { %5749 = vmatmul.mubr.msk.bf16.vlgmr.msra.gmra.mrb[0].mxu0 %vm252_vm2, %v5747_v20  ;;  %v3677_v20 = vsel %vm3675_vm8, %v3672_v18, %v3674_v17  ;;  %vm5103_vm8 = vcmask 39936  }
 0x19d   : > { %2835 = vmatpush1.bf16.msra.mxu0 %v2826_v25  ;;  %2866 = vmatprep.mubr.bf16.mxu0 %v6785_v1  ;;  %v3779_v25 = vpop.permute.xlu1 %3778 }
 0x19e   : > { %5756 = vmatprep.subr.msk.bf16.mxu0 %vm256_vm1, %v2928_v26  ;;  %v3781_v26 = vpop.permute.xlu0 %3780  ;;  %v3783_v32 = vsel %vm3782_vm9, %v3777_v21, %v3779_v25 }
 0x19f   : > { %v3795_v31 = vsel %vm256_vm1, %v3781_v26, 0  ;;  %v3789_v35 = vsel %vm256_vm1, %v3783_v32, 0 }
 0x1a2   : > { %6102 = vmatmul.mubr.msk.bf16.vlgmr.msra.gmra.mrb[0].mxu1 %vm252_vm2, %v5751_v28 }
 0x1a3   : > { %6106 = vmatpush3.bf16.msra.mxu1 %v2939_v29  ;;  %6107 = vmatprep.mubr.msk.bf16.mxu1 %vm6784_vm0, %v6783_v0  ;;  %v3884_v29 = vpop.permute.xlu1 %3883 }
 0x1a4   : > { %6111 = vmatprep.subr.bf16.mxu1 %v6783_v0 }
 0x1a8   : > { %5753 = vmatmul.mubr.msk.bf16.vlgmr.msra.gmra.mrb[0].mxu0 %vm252_vm2, %v5751_v28  ;;  %v3784_v28 = vsel %vm3782_vm9, %v3779_v25, %v3781_v26  ;;  %vm5213_vm9 = vcmask 31744  }
 0x1a9   : > { %2942 = vmatpush1.bf16.msra.mxu0 %v2933_v33  ;;  %2973 = vmatprep.mubr.bf16.mxu0 %v6785_v1  ;;  %v3888_v33 = vpop.permute.xlu1 %3887 }
 0x1aa   : > { %5760 = vmatprep.subr.msk.bf16.mxu0 %vm256_vm1, %v3035_v34  ;;  %v3886_v34 = vpop.permute.xlu0 %3885  ;;  %v3902_v39 = vsel %vm256_vm1, %v3888_v33, 0 }
 0x1ab   : > { %v3890_v40 = vsel %vm3889_vm10, %v3884_v29, %v3886_v34 }
 0x1ac   : > { %v3896_v3 = vsel %vm256_vm1, %v3890_v40, 0 }
 0x1ae   : > { %6108 = vmatmul.mubr.msk.bf16.vlgmr.msra.gmra.mrb[0].mxu1 %vm252_vm2, %v5755_v36 }
 0x1af   : > { %6112 = vmatpush3.bf16.msra.mxu1 %v3046_v37  ;;  %6113 = vmatprep.mubr.msk.bf16.mxu1 %vm6784_vm0, %v6783_v0  ;;  %v3991_v37 = vpop.permute.xlu0 %3990 }
 0x1b0   : > { %6117 = vmatprep.subr.bf16.mxu1 %v6783_v0 }
 0x1b4   : > { %5757 = vmatmul.mubr.msk.bf16.vlgmr.msra.gmra.mrb[0].mxu0 %vm252_vm2, %v5755_v36  ;;  %v3891_v36 = vsel %vm3889_vm10, %v3886_v34, %v3888_v33  ;;  %vm5323_vm10 = vcmask 23552  }
 0x1b5   : > { %3049 = vmatpush1.bf16.msra.mxu0 %v3040_v41  ;;  %3080 = vmatprep.mubr.bf16.mxu0 %v6785_v1  ;;  %v3993_v41 = vpop.permute.xlu1 %3992 }
 0x1b6   : > { %5764 = vmatprep.subr.msk.bf16.mxu0 %vm256_vm1, %v3142_v42  ;;  %v3995_v42 = vpop.permute.xlu0 %3994  ;;  %v3997_v48 = vsel %vm3996_vm11, %v3991_v37, %v3993_v41  ;;  %v5815_v37 = vld [vmem:[%s6920_s30 + $0xa0] sm:$0xf] }
 0x1b7   : > { %v4009_v45 = vsel %vm256_vm1, %v3995_v42, 0  ;;  %v4003_v52 = vsel %vm256_vm1, %v3997_v48, 0 }
 0x1ba   : > { %6114 = vmatmul.mubr.msk.bf16.vlgmr.msra.gmra.mrb[0].mxu1 %vm252_vm2, %v5759_v4 }
 0x1bb   : > { %6118 = vmatpush3.bf16.msra.mxu1 %v3153_v43  ;;  %6119 = vmatprep.mubr.msk.bf16.mxu1 %vm6784_vm0, %v6783_v0  ;;  %v4098_v43 = vpop.permute.xlu1 %4097 }
 0x1bc   : > { %6123 = vmatprep.subr.bf16.mxu1 %v6783_v0 }
 0x1c0   : > { %5761 = vmatmul.mubr.msk.bf16.vlgmr.msra.gmra.mrb[0].mxu0 %vm252_vm2, %v5759_v4  ;;  %v3998_v4 = vsel %vm3996_vm11, %v3993_v41, %v3995_v42  ;;  %vm5433_vm11 = vcmask 15360  }
 0x1c1   : > { %3156 = vmatpush1.bf16.msra.mxu0 %v3147_v49  ;;  %3187 = vmatprep.mubr.bf16.mxu0 %v6785_v1  ;;  %v4102_v49 = vpop.permute.xlu1 %4101 }
 0x1c2   : > { %5768 = vmatprep.subr.msk.bf16.mxu0 %vm256_vm1, %v3249_v50  ;;  %v4100_v50 = vpop.permute.xlu0 %4099  ;;  %v4116_v56 = vsel %vm256_vm1, %v4102_v49, 0 }
 0x1c3   : > { %v4104_v57 = vsel %vm4103_vm12, %v4098_v43, %v4100_v50 }
 0x1c4   : > { %v4110_v58 = vsel %vm256_vm1, %v4104_v57, 0 }
 0x1c6   : > { %6120 = vmatmul.mubr.msk.bf16.vlgmr.msra.gmra.mrb[0].mxu1 %vm252_vm2, %v5763_v53 }
 0x1c7   : > { %6124 = vmatpush3.bf16.msra.mxu1 %v3260_v54  ;;  %6125 = vmatprep.mubr.msk.bf16.mxu1 %vm6784_vm0, %v6783_v0  ;;  %v4205_v54 = vpop.permute.xlu0 %4204 }
 0x1c8   : > { %6129 = vmatprep.subr.bf16.mxu1 %v6783_v0 }
 0x1cc   : > { %5765 = vmatmul.mubr.msk.bf16.vlgmr.msra.gmra.mrb[0].mxu0 %vm252_vm2, %v5763_v53  ;;  %v4105_v53 = vsel %vm4103_vm12, %v4100_v50, %v4102_v49 }
 0x1cd   : > { %3263 = vmatpush1.bf16.msra.mxu0 %v3254_v46  ;;  %3294 = vmatprep.mubr.bf16.mxu0 %v6785_v1  ;;  %v4207_v46 = vpop.permute.xlu1 %4206 }
 0x1ce   : > { %5772 = vmatprep.subr.msk.bf16.mxu0 %vm256_vm1, %v3356_v47  ;;  %v4209_v47 = vpop.permute.xlu0 %4208  ;;  %v4211_v61 = vsel %vm4210_vm13, %v4205_v54, %v4207_v46 }
 0x1cf   : > { %v4223_v51 = vsel %vm256_vm1, %v4209_v47, 0  ;;  %v4217_v5 = vsel %vm256_vm1, %v4211_v61, 0 }
 0x1d2   : > { %6126 = vmatmul.mubr.msk.bf16.vlgmr.msra.gmra.mrb[0].mxu1 %vm252_vm2, %v5767_v59 }
 0x1d3   : > { %6130 = vmatpush3.bf16.msra.mxu1 %v3367_v60  ;;  %6131 = vmatprep.mubr.msk.bf16.mxu1 %vm6784_vm0, %v6783_v0  ;;  %v4312_v60 = vpop.permute.xlu1 %4311 }
 0x1d4   : > { %6135 = vmatprep.subr.bf16.mxu1 %v6783_v0 }
 0x1d8   : > { %5769 = vmatmul.mubr.msk.bf16.vlgmr.msra.gmra.mrb[0].mxu0 %vm252_vm2, %v5767_v59  ;;  %v4212_v59 = vsel %vm4210_vm13, %v4207_v46, %v4209_v47  ;;  %v5827_v46 = vld [vmem:[%s6920_s30 + $0xa8] sm:$0xf] }
 0x1d9   : > { %3370 = vmatpush1.bf16.msra.mxu0 %v3361_v62  ;;  %3401 = vmatprep.mubr.bf16.mxu0 %v6785_v1  ;;  %v4316_v62 = vpop.permute.xlu1 %4315 }
 0x1da   : > { %5776 = vmatprep.subr.msk.bf16.mxu0 %vm256_vm1, %v3463_v63  ;;  %v4314_v63 = vpop.permute.xlu0 %4313  ;;  %v4330_v9 = vsel %vm256_vm1, %v4316_v62, 0 }
 0x1db   : > { %v4318_v10 = vsel %vm4317_vm14, %v4312_v60, %v4314_v63 }
 0x1dc   : > { %v4324_v13 = vsel %vm256_vm1, %v4318_v10, 0 }
 0x1de   : > { %6132 = vmatmul.mubr.msk.bf16.vlgmr.msra.gmra.mrb[0].mxu1 %vm252_vm2, %v5771_v6 }
 0x1df   : > { %6136 = vmatpush3.bf16.msra.mxu1 %v3474_v7  ;;  %6137 = vmatprep.mubr.msk.bf16.mxu1 %vm6784_vm0, %v6783_v0  ;;  %v4419_v7 = vpop.permute.xlu0 %4418 }
 0x1e0   : > { %6141 = vmatprep.subr.bf16.mxu1 %v6783_v0 }
 0x1e4   : > { %5773 = vmatmul.mubr.msk.bf16.vlgmr.msra.gmra.mrb[0].mxu0 %vm252_vm2, %v5771_v6  ;;  %v4319_v6 = vsel %vm4317_vm14, %v4314_v63, %v4316_v62 }
 0x1e5   : > { %3477 = vmatpush1.bf16.msra.mxu0 %v3468_v11  ;;  %3508 = vmatprep.mubr.bf16.mxu0 %v6785_v1  ;;  %v4421_v11 = vpop.permute.xlu1 %4420 }
 0x1e6   : > { %5780 = vmatprep.subr.msk.bf16.mxu0 %vm256_vm1, %v3570_v12  ;;  %v4423_v12 = vpop.permute.xlu0 %4422 }
 0x1e7   : > { %v4437_v17 = vsel %vm256_vm1, %v4423_v12, 0 }
 0x1ea   : > { %6138 = vmatmul.mubr.msk.bf16.vlgmr.msra.gmra.mrb[0].mxu1 %vm252_vm2, %v5775_v14  ;;  %v4548_v18 = vpop.permute.xlu0 %4547 }
 0x1eb   : > { %6142 = vmatpush3.bf16.msra.mxu1 %v3581_v15  ;;  %6143 = vmatprep.mubr.msk.bf16.mxu1 %vm6784_vm0, %v6783_v0  ;;  %v4546_v15 = vpop.permute.xlu1 %4545 }
 0x1ec   : > { %6147 = vmatprep.subr.bf16.mxu1 %v6783_v0 }
 0x1ef   : > { %v4550_v21 = vpop.permute.xlu1 %4549 }
 0x1f0   : > { %5777 = vmatmul.mubr.msk.bf16.vlgmr.msra.gmra.mrb[0].mxu0 %vm252_vm2, %v5775_v14  ;;  %v4426_v14 = vsel %vm4424_vm15, %v4421_v11, %v4423_v12  ;;  %v4555_v24 = vsel %vm4553_vm3, %v4548_v18, %v4550_v21 }
 0x1f1   : > { %3584 = vmatpush1.bf16.msra.mxu0 %v3575_v19  ;;  %3615 = vmatprep.mubr.bf16.mxu0 %v6785_v1  ;;  %v228_v19 = vld [vmem:[%s7674_s2] sm:$0xff] }
 0x1f2   : > { %5784 = vmatprep.subr.msk.bf16.mxu0 %vm256_vm1, %v3677_v20  ;;  %231 = vperm.xlu1 %6731, %v228_v19   ;;  %v4425_v20 = vsel %vm4424_vm15, %v4419_v7, %v4421_v11 }
 0x1f3   : > { %v4656_v26 = vpop.permute.xlu1 %4655 }
 0x1f6   : > { %6144 = vmatmul.mubr.msk.bf16.vlgmr.msra.gmra.mrb[0].mxu1 %vm252_vm2, %v5779_v22 }
 0x1f7   : > { %6148 = vmatpush3.bf16.msra.mxu1 %v3688_v23  ;;  %6149 = vmatprep.mubr.msk.bf16.mxu1 %vm6784_vm0, %v6783_v0  ;;  %v4552_v23 = vpop.permute.xlu0 %4551 }
 0x1f8   : > { %6153 = vmatprep.subr.bf16.mxu1 %v6783_v0  ;;  %v4556_v25 = vsel %vm4553_vm3, %v4550_v21, %v4552_v23 }
 0x1fb   : > { %v4658_v29 = vpop.permute.xlu0 %4657 }
 0x1fc   : > { %5781 = vmatmul.mubr.msk.bf16.vlgmr.msra.gmra.mrb[0].mxu0 %vm252_vm2, %v5779_v22  ;;  %v4431_v22 = vsel %vm256_vm1, %v4425_v20, 0  ;;  %v4664_v40 = vsel %vm4663_vm4, %v4656_v26, %v4658_v29 }
 0x1fd   : > { %3691 = vmatpush1.bf16.msra.mxu0 %v3682_v27  ;;  %3722 = vmatprep.mubr.bf16.mxu0 %v6785_v1  ;;  %v5811_v27 = vld [vmem:[%s6920_s30 + $0x9c] sm:$0xf]  ;;  %v4671_v42 = vsel %vm256_vm1, %v4664_v40, 0 }
 0x1fe   : > { %5788 = vmatprep.subr.msk.bf16.mxu0 %vm256_vm1, %v3784_v28  ;;  %v4567_v28 = vsel %vm256_vm1, %v4556_v25, 0  ;;  %v5839_v25 = vld [vmem:[%s6920_s30 + $0xb4] sm:$0xf] }
 0x1ff   : > { %v4662_v33 = vpop.permute.xlu0 %4661 }
 0x202   : > { %6150 = vmatmul.mubr.msk.bf16.vlgmr.msra.gmra.mrb[0].mxu1 %vm252_vm2, %v5783_v30 }
 0x203   : > { %6154 = vmatpush3.bf16.msra.mxu1 %v3795_v31  ;;  %6155 = vmatprep.mubr.msk.bf16.mxu1 %vm6784_vm0, %v6783_v0  ;;  %v4660_v31 = vpop.permute.xlu1 %4659 }
 0x204   : > { %6159 = vmatprep.subr.bf16.mxu1 %v6783_v0  ;;  %v4665_v34 = vsel %vm4663_vm4, %v4658_v29, %v4660_v31 }
 0x208   : > { %5785 = vmatmul.mubr.msk.bf16.vlgmr.msra.gmra.mrb[0].mxu0 %vm252_vm2, %v5783_v30  ;;  %v4554_v30 = vsel %vm4553_vm3, %v4546_v15, %v4548_v18  ;;  %v5835_v15 = vld [vmem:[%s6920_s30 + $0xb0] sm:$0xf] }
 0x209   : > { %3798 = vmatpush1.bf16.msra.mxu0 %v3789_v35  ;;  %3829 = vmatprep.mubr.bf16.mxu0 %v6785_v1  ;;  %v4561_v32 = vsel %vm256_vm1, %v4554_v30, 0  ;;  %v4666_v35 = vsel %vm4663_vm4, %v4660_v31, %v4662_v33 }
 0x20a   : > { %5792 = vmatprep.subr.msk.bf16.mxu0 %vm256_vm1, %v3891_v36  ;;  %v4766_v36 = vpop.permute.xlu1 %4765 }
 0x20e   : > { %6156 = vmatmul.mubr.msk.bf16.vlgmr.msra.gmra.mrb[0].mxu1 %vm252_vm2, %v5787_v38  ;;  %v4770_v41 = vpop.permute.xlu1 %4769 }
 0x20f   : > { %6160 = vmatpush3.bf16.msra.mxu1 %v3902_v39  ;;  %6161 = vmatprep.mubr.msk.bf16.mxu1 %vm6784_vm0, %v6783_v0  ;;  %v4768_v39 = vpop.permute.xlu0 %4767 }
 0x210   : > { %6165 = vmatprep.subr.bf16.mxu1 %v6783_v0  ;;  %v4774_v50 = vsel %vm4773_vm5, %v4766_v36, %v4768_v39 }
 0x214   : > { %5789 = vmatmul.mubr.msk.bf16.vlgmr.msra.gmra.mrb[0].mxu0 %vm252_vm2, %v5787_v38  ;;  %v4677_v38 = vsel %vm256_vm1, %v4666_v35, 0  ;;  %v5843_v35 = vld [vmem:[%s6920_s30 + $0xb8] sm:$0xf] }
 0x215   : > { %3905 = vmatpush1.bf16.msra.mxu0 %v3896_v3  ;;  %3936 = vmatprep.mubr.bf16.mxu0 %v6785_v1  ;;  %v4772_v3 = vpop.permute.xlu0 %4771 }
 0x216   : > { %5796 = vmatprep.subr.msk.bf16.mxu0 %vm256_vm1, %v3998_v4  ;;  %v4775_v4 = vsel %vm4773_vm5, %v4768_v39, %v4770_v41  ;;  %v4776_v43 = vsel %vm4773_vm5, %v4770_v41, %v4772_v3 }
 0x217   : > { %v4787_v48 = vsel %vm256_vm1, %v4776_v43, 0 }
 0x219   : > { %v4878_v49 = vpop.permute.xlu0 %4877 }
 0x21a   : > { %6162 = vmatmul.mubr.msk.bf16.vlgmr.msra.gmra.mrb[0].mxu1 %vm252_vm2, %v5791_v44 }
 0x21b   : > { %6166 = vmatpush3.bf16.msra.mxu1 %v4009_v45  ;;  %6167 = vmatprep.mubr.msk.bf16.mxu1 %vm6784_vm0, %v6783_v0  ;;  %v5823_v45 = vld [vmem:[%s6920_s30 + $0xa4] sm:$0xf] }
 0x21c   : > { %6171 = vmatprep.subr.bf16.mxu1 %v6783_v0 }
 0x21d   : > { %v4882_v54 = vpop.permute.xlu0 %4881 }
 0x220   : > { %5793 = vmatmul.mubr.msk.bf16.vlgmr.msra.gmra.mrb[0].mxu0 %vm252_vm2, %v5791_v44  ;;  %v4876_v44 = vpop.permute.xlu1 %4875 }
 0x221   : > { %4012 = vmatpush1.bf16.msra.mxu0 %v4003_v52  ;;  %4043 = vmatprep.mubr.bf16.mxu0 %v6785_v1 }
 0x222   : > { %5800 = vmatprep.subr.msk.bf16.mxu0 %vm256_vm1, %v4105_v53  ;;  %v4781_v53 = vsel %vm256_vm1, %v4774_v50, 0 }
 0x224   : > { %v4880_v52 = vpop.permute.xlu1 %4879 }
 0x226   : > { %6168 = vmatmul.mubr.msk.bf16.vlgmr.msra.gmra.mrb[0].mxu1 %vm252_vm2, %v5795_v55 }
 0x227   : > { %6172 = vmatpush3.bf16.msra.mxu1 %v4116_v56  ;;  %6173 = vmatprep.mubr.msk.bf16.mxu1 %vm6784_vm0, %v6783_v0  ;;  %v4886_v56 = vsel %vm4883_vm6, %v4880_v52, %v4882_v54 }
 0x228   : > { %6177 = vmatprep.subr.bf16.mxu1 %v6783_v0  ;;  %v4986_v57 = vpop.permute.xlu1 %4985  ;;  %v4897_v47 = vsel %vm256_vm1, %v4886_v56, 0 }
 0x22c   : > { %5797 = vmatmul.mubr.msk.bf16.vlgmr.msra.gmra.mrb[0].mxu0 %vm252_vm2, %v5795_v55  ;;  %v4885_v55 = vsel %vm4883_vm6, %v4878_v49, %v4880_v52  ;;  %v4990_v60 = vpop.permute.xlu1 %4989 }
 0x22d   : > { %4119 = vmatpush1.bf16.msra.mxu0 %v4110_v58  ;;  %4150 = vmatprep.mubr.bf16.mxu0 %v6785_v1  ;;  %v4988_v58 = vpop.permute.xlu0 %4987 }
 0x22e   : > { %5804 = vmatprep.subr.msk.bf16.mxu0 %vm256_vm1, %v4212_v59  ;;  %v4884_v59 = vsel %vm4883_vm6, %v4876_v44, %v4878_v49  ;;  %v4995_v61 = vsel %vm4993_vm7, %v4988_v58, %v4990_v60 }
 0x230   : > { %v5096_v63 = vpop.permute.xlu1 %5095 }
 0x232   : > { %6174 = vmatmul.mubr.msk.bf16.vlgmr.msra.gmra.mrb[0].mxu1 %vm252_vm2, %v5799_v2 }
 0x233   : > { %6178 = vmatpush3.bf16.msra.mxu1 %v4223_v51  ;;  %6179 = vmatprep.mubr.msk.bf16.mxu1 %vm6784_vm0, %v6783_v0  ;;  %v4992_v51 = vpop.permute.xlu0 %4991 }
 0x234   : > { %6183 = vmatprep.subr.bf16.mxu1 %v6783_v0  ;;  %v4996_v62 = vsel %vm4993_vm7, %v4990_v60, %v4992_v51 }
 0x237   : > { %v5098_v7 = vpop.permute.xlu0 %5097 }
 0x238   : > { %5801 = vmatmul.mubr.msk.bf16.vlgmr.msra.gmra.mrb[0].mxu0 %vm252_vm2, %v5799_v2  ;;  %v4891_v2 = vsel %vm256_vm1, %v4884_v59, 0  ;;  %v5104_v18 = vsel %vm5103_vm8, %v5096_v63, %v5098_v7 }
 0x239   : > { %4226 = vmatpush1.bf16.msra.mxu0 %v4217_v5  ;;  %4257 = vmatprep.mubr.bf16.mxu0 %v6785_v1  ;;  %v5831_v5 = vld [vmem:[%s6920_s30 + $0xac] sm:$0xf]  ;;  %v5111_v20 = vsel %vm256_vm1, %v5104_v18, 0 }
 0x23a   : > { %5808 = vmatprep.subr.msk.bf16.mxu0 %vm256_vm1, %v4319_v6  ;;  %v5007_v6 = vsel %vm256_vm1, %v4996_v62, 0 }
 0x23b   : > { %v5102_v11 = vpop.permute.xlu0 %5101 }
 0x23e   : > { %6180 = vmatmul.mubr.msk.bf16.vlgmr.msra.gmra.mrb[0].mxu1 %vm252_vm2, %v5803_v8 }
 0x23f   : > { %6184 = vmatpush3.bf16.msra.mxu1 %v4330_v9  ;;  %6185 = vmatprep.mubr.msk.bf16.mxu1 %vm6784_vm0, %v6783_v0  ;;  %v5100_v9 = vpop.permute.xlu1 %5099 }
 0x240   : > { %6189 = vmatprep.subr.bf16.mxu1 %v6783_v0  ;;  %v5105_v12 = vsel %vm5103_vm8, %v5098_v7, %v5100_v9 }
 0x244   : > { %5805 = vmatmul.mubr.msk.bf16.vlgmr.msra.gmra.mrb[0].mxu0 %vm252_vm2, %v5803_v8  ;;  %v4994_v8 = vsel %vm4993_vm7, %v4986_v57, %v4988_v58 }
 0x245   : > { %4333 = vmatpush1.bf16.msra.mxu0 %v4324_v13  ;;  %4364 = vmatprep.mubr.bf16.mxu0 %v6785_v1  ;;  %v5001_v10 = vsel %vm256_vm1, %v4994_v8, 0  ;;  %v5106_v13 = vsel %vm5103_vm8, %v5100_v9, %v5102_v11 }
 0x246   : > { %5812 = vmatprep.subr.msk.bf16.mxu0 %vm256_vm1, %v4426_v14  ;;  %v5206_v14 = vpop.permute.xlu1 %5205 }
 0x24a   : > { %6186 = vmatmul.mubr.msk.bf16.vlgmr.msra.gmra.mrb[0].mxu1 %vm252_vm2, %v5807_v16  ;;  %v5210_v19 = vpop.permute.xlu1 %5209 }
 0x24b   : > { %6190 = vmatpush3.bf16.msra.mxu1 %v4437_v17  ;;  %6191 = vmatprep.mubr.msk.bf16.mxu1 %vm6784_vm0, %v6783_v0  ;;  %v5208_v17 = vpop.permute.xlu0 %5207 }
 0x24c   : > { %6195 = vmatprep.subr.bf16.mxu1 %v6783_v0 }
 0x24f   : > { %v5212_v21 = vpop.permute.xlu0 %5211 }
 0x250   : > { %5809 = vmatmul.mubr.msk.bf16.vlgmr.msra.gmra.mrb[0].mxu0 %vm252_vm2, %v5807_v16  ;;  %v5117_v16 = vsel %vm256_vm1, %v5106_v13, 0  ;;  %v5216_v23 = vsel %vm5213_vm9, %v5210_v19, %v5212_v21 }
 0x251   : > { %4440 = vmatpush1.bf16.msra.mxu0 %v4431_v22  ;;  %4471 = vmatprep.mubr.bf16.mxu0 %v6785_v1  ;;  %v5215_v22 = vsel %vm5213_vm9, %v5208_v17, %v5210_v19  ;;  %v5227_v26 = vsel %vm256_vm1, %v5216_v23, 0 }
 0x252   : > { %5820 = vmatprep.subr.msk.bf16.mxu0 %vm256_vm1, %v4555_v24  ;;  %v5316_v24 = vpop.permute.xlu1 %5315 }
 0x256   : > { %6192 = vmatmul.mubr.msk.bf16.vlgmr.msra.gmra.mrb[0].mxu1 %vm252_vm2, %v5811_v27  ;;  %v5320_v29 = vpop.permute.xlu1 %5319 }
 0x257   : > { %6196 = vmatpush3.bf16.msra.mxu1 %v4567_v28  ;;  %6197 = vmatprep.mubr.msk.bf16.mxu1 %vm6784_vm0, %v6783_v0  ;;  %v5214_v28 = vsel %vm5213_vm9, %v5206_v14, %v5208_v17 }
 0x258   : > { %6201 = vmatprep.subr.bf16.mxu1 %v6783_v0  ;;  %v5221_v30 = vsel %vm256_vm1, %v5214_v28, 0 }
 0x25c   : > { %5813 = vmatmul.mubr.msk.bf16.vlgmr.msra.gmra.mrb[0].mxu0 %vm252_vm2, %v5811_v27  ;;  %v5318_v27 = vpop.permute.xlu0 %5317 }
 0x25d   : > { %4570 = vmatpush1.bf16.msra.mxu0 %v4561_v32  ;;  %4601 = vmatprep.mubr.bf16.mxu0 %v6785_v1  ;;  %v5325_v32 = vsel %vm5323_vm10, %v5318_v27, %v5320_v29 }
 0x25e   : > { %5824 = vmatprep.subr.msk.bf16.mxu0 %vm256_vm1, %v4665_v34  ;;  %v5426_v34 = vpop.permute.xlu1 %5425 }
 0x260   : > { %v5322_v31 = vpop.permute.xlu0 %5321 }
 0x261   : > { %v5326_v33 = vsel %vm5323_vm10, %v5320_v29, %v5322_v31 }
 0x262   : > { %6198 = vmatmul.mubr.msk.bf16.vlgmr.msra.gmra.mrb[0].mxu1 %vm252_vm2, %v5815_v37  ;;  %v5337_v36 = vsel %vm256_vm1, %v5326_v33, 0  ;;  %v5430_v39 = vpop.permute.xlu1 %5429 }
 0x263   : > { %6202 = vmatpush3.bf16.msra.mxu1 %v4677_v38  ;;  %6203 = vmatprep.mubr.msk.bf16.mxu1 %vm6784_vm0, %v6783_v0  ;;  %v5324_v38 = vsel %vm5323_vm10, %v5316_v24, %v5318_v27 }
 0x264   : > { %6207 = vmatprep.subr.bf16.mxu1 %v6783_v0  ;;  %v5331_v40 = vsel %vm256_vm1, %v5324_v38, 0 }
 0x268   : > { %5821 = vmatmul.mubr.msk.bf16.vlgmr.msra.gmra.mrb[0].mxu0 %vm252_vm2, %v5815_v37  ;;  %v5428_v37 = vpop.permute.xlu0 %5427 }
 0x269   : > { %4680 = vmatpush1.bf16.msra.mxu0 %v4671_v42  ;;  %4711 = vmatprep.mubr.bf16.mxu0 %v6785_v1  ;;  %v5435_v42 = vsel %vm5433_vm11, %v5428_v37, %v5430_v39  ;;  %v5434_v44 = vsel %vm5433_vm11, %v5426_v34, %v5428_v37 }
 0x26a   : > { %5828 = vmatprep.subr.msk.bf16.mxu0 %vm256_vm1, %v4775_v4  ;;  %v5847_v4 = vld [vmem:[%s6920_s30 + $0xbc] sm:$0xf] }
 0x26c   : > { %v5432_v41 = vpop.permute.xlu0 %5431 }
 0x26d   : > { %v5436_v3 = vsel %vm5433_vm11, %v5430_v39, %v5432_v41 }
 0x26e   : > { %6204 = vmatmul.mubr.msk.bf16.vlgmr.msra.gmra.mrb[0].mxu1 %vm252_vm2, %v5823_v45  ;;  %v5447_v43 = vsel %vm256_vm1, %v5436_v3, 0 }
 0x26f   : > { %6208 = vmatpush3.bf16.msra.mxu1 %v4787_v48  ;;  %6209 = vmatprep.mubr.msk.bf16.mxu1 %vm6784_vm0, %v6783_v0  ;;  %v5851_v48 = vld [vmem:[%s6920_s30 + $0xc0] sm:$0xf] }
 0x270   : > { %6213 = vmatprep.subr.bf16.mxu1 %v6783_v0 }
 0x271   : > { %v232_v49 = vpop.permute.xlu1 %231 }
 0x274   : > { %5825 = vmatmul.mubr.msk.bf16.vlgmr.msra.gmra.mrb[0].mxu0 %vm252_vm2, %v5823_v45  ;;  %v5441_v45 = vsel %vm256_vm1, %v5434_v44, 0 }
 0x275   : > { %4790 = vmatpush1.bf16.msra.mxu0 %v4781_v53  ;;  %4821 = vmatprep.mubr.bf16.mxu0 %v6785_v1 }
 0x276   : > { %5832 = vmatprep.subr.msk.bf16.mxu0 %vm256_vm1, %v4885_v55 }
 0x27a   : > { %6210 = vmatmul.mubr.msk.bf16.vlgmr.msra.gmra.mrb[0].mxu1 %vm252_vm2, %v5827_v46 }
 0x27b   : > { %6214 = vmatpush3.bf16.msra.mxu1 %v4897_v47  ;;  %6215 = vmatprep.mubr.msk.bf16.mxu1 %vm6784_vm0, %v6783_v0 }
 0x27c   : > { %6219 = vmatprep.subr.bf16.mxu1 %v6783_v0 }
 0x280   : > { %5829 = vmatmul.mubr.msk.bf16.vlgmr.msra.gmra.mrb[0].mxu0 %vm252_vm2, %v5827_v46 }
 0x281   : > { %4900 = vmatpush1.bf16.msra.mxu0 %v4891_v2  ;;  %4931 = vmatprep.mubr.bf16.mxu0 %v6785_v1 }
 0x282   : > { %5836 = vmatprep.subr.msk.bf16.mxu0 %vm256_vm1, %v4995_v61 }
 0x286   : > { %6216 = vmatmul.mubr.msk.bf16.vlgmr.msra.gmra.mrb[0].mxu1 %vm252_vm2, %v5831_v5 }
 0x287   : > { %6220 = vmatpush3.bf16.msra.mxu1 %v5007_v6  ;;  %6221 = vmatprep.mubr.msk.bf16.mxu1 %vm6784_vm0, %v6783_v0 }
 0x288   : > { %6225 = vmatprep.subr.bf16.mxu1 %v6783_v0 }
 0x28c   : > { %5833 = vmatmul.mubr.msk.bf16.vlgmr.msra.gmra.mrb[0].mxu0 %vm252_vm2, %v5831_v5 }
 0x28d   : > { %5010 = vmatpush1.bf16.msra.mxu0 %v5001_v10  ;;  %5041 = vmatprep.mubr.bf16.mxu0 %v6785_v1 }
 0x28e   : > { %5840 = vmatprep.subr.msk.bf16.mxu0 %vm256_vm1, %v5105_v12 }
 0x292   : > { %6222 = vmatmul.mubr.msk.bf16.vlgmr.msra.gmra.mrb[0].mxu1 %vm252_vm2, %v5835_v15 }
 0x293   : > { %6226 = vmatpush3.bf16.msra.mxu1 %v5117_v16  ;;  %6227 = vmatprep.mubr.msk.bf16.mxu1 %vm6784_vm0, %v6783_v0 }
 0x294   : > { %6231 = vmatprep.subr.bf16.mxu1 %v6783_v0 }
 0x298   : > { %5837 = vmatmul.mubr.msk.bf16.vlgmr.msra.gmra.mrb[0].mxu0 %vm252_vm2, %v5835_v15 }
 0x299   : > { %5120 = vmatpush1.bf16.msra.mxu0 %v5111_v20  ;;  %5151 = vmatprep.mubr.bf16.mxu0 %v6785_v1 }
 0x29a   : > { %5844 = vmatprep.subr.msk.bf16.mxu0 %vm256_vm1, %v5215_v22 }
 0x29e   : > { %6228 = vmatmul.mubr.msk.bf16.vlgmr.msra.gmra.mrb[0].mxu1 %vm252_vm2, %v5839_v25 }
 0x29f   : > { %6232 = vmatpush3.bf16.msra.mxu1 %v5227_v26  ;;  %6233 = vmatprep.mubr.msk.bf16.mxu1 %vm6784_vm0, %v6783_v0 }
 0x2a0   : > { %6237 = vmatprep.subr.bf16.mxu1 %v6783_v0 }
 0x2a4   : > { %5841 = vmatmul.mubr.msk.bf16.vlgmr.msra.gmra.mrb[0].mxu0 %vm252_vm2, %v5839_v25 }
 0x2a5   : > { %5230 = vmatpush1.bf16.msra.mxu0 %v5221_v30  ;;  %5261 = vmatprep.mubr.bf16.mxu0 %v6785_v1 }
 0x2a6   : > { %5848 = vmatprep.subr.msk.bf16.mxu0 %vm256_vm1, %v5325_v32 }
 0x2aa   : > { %6234 = vmatmul.mubr.msk.bf16.vlgmr.msra.gmra.mrb[0].mxu1 %vm252_vm2, %v5843_v35 }
 0x2ab   : > { %6238 = vmatpush3.bf16.msra.mxu1 %v5337_v36  ;;  %6239 = vmatprep.mubr.msk.bf16.mxu1 %vm6784_vm0, %v6783_v0 }
 0x2ac   : > { %6243 = vmatprep.subr.bf16.mxu1 %v6783_v0 }
 0x2b0   : > { %5845 = vmatmul.mubr.msk.bf16.vlgmr.msra.gmra.mrb[0].mxu0 %vm252_vm2, %v5843_v35 }
 0x2b1   : > { %5340 = vmatpush1.bf16.msra.mxu0 %v5331_v40  ;;  %5371 = vmatprep.mubr.bf16.mxu0 %v6785_v1 }
 0x2b2   : > { %5852 = vmatprep.subr.msk.bf16.mxu0 %vm256_vm1, %v5435_v42 }
 0x2b6   : > { %6240 = vmatmul.mubr.msk.bf16.vlgmr.msra.gmra.mrb[0].mxu1 %vm252_vm2, %v5847_v4 }
 0x2b7   : > { %6244 = vmatpush3.bf16.msra.mxu1 %v5447_v43  ;;  %6245 = vmatprep.mubr.msk.bf16.mxu1 %vm6784_vm0, %v6783_v0 }
 0x2bc   : > { %5849 = vmatmul.mubr.msk.bf16.vlgmr.msra.gmra.mrb[0].mxu0 %vm252_vm2, %v5847_v4 }
 0x2bd   : > { %5450 = vmatpush1.bf16.msra.mxu0 %v5441_v45  ;;  %5481 = vmatprep.mubr.bf16.mxu0 %v6785_v1 }
 0x2c2   : > { %6246 = vmatmul.mubr.msk.bf16.vlgmr.msra.gmra.mrb[0].mxu1 %vm252_vm2, %v5851_v48 }
 0x2c8   : > { %5853 = vmatmul.mubr.msk.bf16.vlgmr.msra.gmra.mrb[0].mxu0 %vm252_vm2, %v5851_v48 }
 0x395   : > { %v5524_v50 = vpop.f32.mrb[0].mxu1 }
 0x396   : > { %v6251_v0 = vadd.f32 %v5524_v50, %v232_v49  ;;  %v6247_v52 = vpop.f32.mrb[1].mxu1 }
 0x397   : > { %v5527_v53 = vpop.f32.mrb[2].mxu1 }
 0x398   : > { %v6248_v54 = vpop.f32.mrb[3].mxu1  ;;  %5536 = vst.msk [vmem:[%s226_s4 + $0x10] sm:$0xff] %vm4424_vm15, %v6251_v0 }
 0x39b   : > { %v5483_v1 = vpop.f32.mrb[0].mxu0 }
 0x39c   : > { %v6249_v55 = vadd.f32 %v5483_v1, %v232_v49  ;;  %v5485_v56 = vpop.f32.mrb[1].mxu0 }
 0x39d   : > { %v6250_v57 = vadd.f32 %v5485_v56, %v232_v49  ;;  %v5487_v46 = vpop.f32.mrb[2].mxu0 }
 0x39e   : > { %5533 = vst [vmem:[%s226_s4] sm:$0xff] %v6249_v55  ;;  %v5488_v47 = vpop.f32.mrb[3].mxu0 }
 0x39f   : > { %5534 = vst [vmem:[%s226_s4 + $0x8] sm:$0xff] %v6250_v57 }
 0x3a0 PF: > { %s13_s16 = sadd.s32 1, %s6781_s16   ;;  %s7676_s12 = smov %s6773_s14 }
 0x3a1   : > { %p10_p7 = scmp.ge.s32.totalorder %s13_s16, 8   ;;  %s7677_s13 = smov %s6777_s15 }
 0x3a2   : > { %s7678_s14 = smov %s7681_s17  ;;  %s7679_s15 = smov %s7685_s18 }
 0x3a3   :  { %12 = sbr.rel (!%p10_p7) target bundleno = 3 (0x3), region = 113 }

</bundles_post_ra>
